<compile_context>
chip_gen: v7x
topology: tpu7x:2x2x1
jax: 0.10.0
libtpu: 0.0.40
codegen_flags: <defaults>
</compile_context>

<pallas_src>
import math

import jax
import jax.numpy as jnp
from jax.experimental import pallas as pl
from jax.experimental.pallas import tpu as pltpu

# ---------------- config (small, BERT-like) ----------------
VOCAB = 50
TYPE_VOCAB = 2
MAX_POS = 16
HIDDEN = 32
NUM_HEADS = 4
HEAD_DIM = HIDDEN // NUM_HEADS
INTERMEDIATE = 64
NUM_LAYERS = 2
NUM_LABELS = 3
BATCH = 2
SEQ = 8
TOKENS = BATCH * SEQ
LN_EPS = 1e-12
LOGIT_PAD = 128  # lane-dense output slab; real logits live in the first NUM_LABELS cols


# ---------------- in-kernel helpers (f32 elementwise math) ----------------
def _layernorm(x, g, b):
    mu = jnp.mean(x, axis=-1, keepdims=True)
    xc = x - mu
    var = jnp.mean(xc * xc, axis=-1, keepdims=True)
    return xc * jax.lax.rsqrt(var + LN_EPS) * g + b


def _gelu(x):
    # tanh-approx GELU (f32 on VPU/EUP)
    return 0.5 * x * (1.0 + jnp.tanh(0.7978845608028654 * (x + 0.044715 * x * x * x)))


# ---------------- the fused encoder + head kernel ----------------
def _encoder_kernel(
    emb_ref, bias_ref, embg_ref, embb_ref,
    wqkv_ref, bqkv_ref, wo_ref, bo_ref, ln1g_ref, ln1b_ref,
    w1_ref, b1_ref, w2_ref, b2_ref, ln2g_ref, ln2b_ref,
    hw1_ref, hb1_ref, hw2_ref, hb2_ref,
    out_ref, h_scratch,
):
    li = pl.program_id(0)

    # Grid step 0: embedding LayerNorm seeds the VMEM-resident hidden state.
    @pl.when(li == 0)
    def _():
        h_scratch[...] = _layernorm(
            emb_ref[...].astype(jnp.float32), embg_ref[...], embb_ref[...]
        )

    x = h_scratch[...]  # (T, H) f32, resident across layers

    # --- fused QKV projection: one (H, 3H) matmul, bf16 operands, f32 accumulation ---
    qkv = (
        jnp.dot(x.astype(jnp.bfloat16), wqkv_ref[...],
                preferred_element_type=jnp.float32)
        + bqkv_ref[...]
    )  # (T, 3H)
    q = qkv[:, 0 * HIDDEN:1 * HIDDEN]
    k = qkv[:, 1 * HIDDEN:2 * HIDDEN]
    v = qkv[:, 2 * HIDDEN:3 * HIDDEN]

    # --- multi-head attention, head split via static lane slices (in VMEM) ---
    # Scores are computed over all tokens jointly; bias_ref carries -1e9 for
    # cross-example pairs and padded keys, so softmax normalizes per example.
    scale = 1.0 / math.sqrt(HEAD_DIM)
    bias = bias_ref[...]                                        # (T, T)
    col = jax.lax.broadcasted_iota(jnp.int32, (TOKENS, HIDDEN), 1)
    ctx = jnp.zeros((TOKENS, HIDDEN), jnp.float32)
    for h in range(NUM_HEADS):
        lo = h * HEAD_DIM
        qh = q[:, lo:lo + HEAD_DIM]                             # (T, DH)
        kh = k[:, lo:lo + HEAD_DIM]
        s = jnp.einsum("qd,kd->qk", qh, kh,
                       preferred_element_type=jnp.float32) * scale + bias
        m = jnp.max(s, axis=-1, keepdims=True)
        p = jnp.exp(s - m)
        p = p / jnp.sum(p, axis=-1, keepdims=True)              # (T, T) f32
        # Zero every column of v except this head's; P @ v_masked then lands the
        # head's context in its own columns, and summing over heads assembles
        # the full (T, H) context without any transpose/reshape.
        v_h = jnp.where((col >= lo) & (col < lo + HEAD_DIM), v, 0.0)
        ctx = ctx + jnp.dot(p, v_h, preferred_element_type=jnp.float32)

    # --- attention output projection + residual + LayerNorm ---
    attn_out = (
        jnp.dot(ctx.astype(jnp.bfloat16), wo_ref[...],
                preferred_element_type=jnp.float32)
        + bo_ref[...]
    )
    h1 = _layernorm(attn_out + x, ln1g_ref[...], ln1b_ref[...])

    # --- FFN (GELU) + residual + LayerNorm ---
    ff = (
        jnp.dot(h1.astype(jnp.bfloat16), w1_ref[...],
                preferred_element_type=jnp.float32)
        + b1_ref[...]
    )
    ff = _gelu(ff)
    ff = (
        jnp.dot(ff.astype(jnp.bfloat16), w2_ref[...],
                preferred_element_type=jnp.float32)
        + b2_ref[...]
    )
    h2 = _layernorm(ff + h1, ln2g_ref[...], ln2b_ref[...])
    h_scratch[...] = h2

    # --- classifier head (linear -> ReLU -> out), fused into the same kernel.
    # Computed for every token row (cost is negligible); the wrapper keeps only
    # the CLS rows.  The (T, 128) output slab is lane-dense (no masked stores).
    hd = jnp.maximum(
        jnp.dot(h2.astype(jnp.bfloat16), hw1_ref[...],
                preferred_element_type=jnp.float32) + hb1_ref[...],
        0.0,
    )
    logits = (
        jnp.dot(hd.astype(jnp.bfloat16), hw2_ref[...],
                preferred_element_type=jnp.float32)
        + hb2_ref[...]
    )
    out_ref[...] = logits.astype(out_ref.dtype)


# ---------------- parameter init (deterministic synthetic BERT) ----------------
def init_params(key):
    def nrm(k, shape):
        return 0.02 * jax.random.normal(k, shape, dtype=jnp.float32)

    keys = jax.random.split(key, 8 + NUM_LAYERS)
    p = {
        "word_emb": nrm(keys[0], (VOCAB, HIDDEN)),
        "pos_emb": nrm(keys[1], (MAX_POS, HIDDEN)),
        "type_emb": nrm(keys[2], (TYPE_VOCAB, HIDDEN)),
        "emb_ln_g": jnp.ones((HIDDEN,), jnp.float32),
        "emb_ln_b": jnp.zeros((HIDDEN,), jnp.float32),
        "head_w1": nrm(keys[3], (HIDDEN, HIDDEN)),
        "head_b1": jnp.zeros((HIDDEN,), jnp.float32),
        "head_w2": nrm(keys[4], (HIDDEN, NUM_LABELS)),
        "head_b2": jnp.zeros((NUM_LABELS,), jnp.float32),
        "layers": [],
    }
    for li in range(NUM_LAYERS):
        lk = jax.random.split(keys[8 + li], 6)
        p["layers"].append(
            {
                "wq": nrm(lk[0], (HIDDEN, HIDDEN)), "bq": jnp.zeros((HIDDEN,), jnp.float32),
                "wk": nrm(lk[1], (HIDDEN, HIDDEN)), "bk": jnp.zeros((HIDDEN,), jnp.float32),
                "wv": nrm(lk[2], (HIDDEN, HIDDEN)), "bv": jnp.zeros((HIDDEN,), jnp.float32),
                "wo": nrm(lk[3], (HIDDEN, HIDDEN)), "bo": jnp.zeros((HIDDEN,), jnp.float32),
                "ln1_g": jnp.ones((HIDDEN,), jnp.float32), "ln1_b": jnp.zeros((HIDDEN,), jnp.float32),
                "w1": nrm(lk[4], (HIDDEN, INTERMEDIATE)), "b1": jnp.zeros((INTERMEDIATE,), jnp.float32),
                "w2": nrm(lk[5], (INTERMEDIATE, HIDDEN)), "b2": jnp.zeros((HIDDEN,), jnp.float32),
                "ln2_g": jnp.ones((HIDDEN,), jnp.float32), "ln2_b": jnp.zeros((HIDDEN,), jnp.float32),
            }
        )
    return p


def pack_params(p):
    """Stack per-layer weights on a leading layer axis; fuse QKV; cast matmul
    weights to bf16; pad the classifier output weights to a 128-wide lane slab."""
    def stack(fn):
        return jnp.stack([fn(lp) for lp in p["layers"]], axis=0)

    return {
        "word_emb": p["word_emb"],
        "pos_emb": p["pos_emb"],
        "type_emb": p["type_emb"],
        "emb_ln_g": p["emb_ln_g"].reshape(1, HIDDEN),
        "emb_ln_b": p["emb_ln_b"].reshape(1, HIDDEN),
        "wqkv": stack(lambda lp: jnp.concatenate([lp["wq"], lp["wk"], lp["wv"]], axis=1)
                      ).astype(jnp.bfloat16),                         # (L, H, 3H)
        "bqkv": stack(lambda lp: jnp.concatenate([lp["bq"], lp["bk"], lp["bv"]]
                                                 ).reshape(1, 3 * HIDDEN)),
        "wo": stack(lambda lp: lp["wo"]).astype(jnp.bfloat16),
        "bo": stack(lambda lp: lp["bo"].reshape(1, HIDDEN)),
        "ln1_g": stack(lambda lp: lp["ln1_g"].reshape(1, HIDDEN)),
        "ln1_b": stack(lambda lp: lp["ln1_b"].reshape(1, HIDDEN)),
        "w1": stack(lambda lp: lp["w1"]).astype(jnp.bfloat16),
        "b1": stack(lambda lp: lp["b1"].reshape(1, INTERMEDIATE)),
        "w2": stack(lambda lp: lp["w2"]).astype(jnp.bfloat16),
        "b2": stack(lambda lp: lp["b2"].reshape(1, HIDDEN)),
        "ln2_g": stack(lambda lp: lp["ln2_g"].reshape(1, HIDDEN)),
        "ln2_b": stack(lambda lp: lp["ln2_b"].reshape(1, HIDDEN)),
        "head_w1": p["head_w1"].astype(jnp.bfloat16),
        "head_b1": p["head_b1"].reshape(1, HIDDEN),
        "head_w2": jnp.zeros((HIDDEN, LOGIT_PAD), jnp.float32)
                     .at[:, :NUM_LABELS].set(p["head_w2"]).astype(jnp.bfloat16),
        "head_b2": jnp.zeros((1, LOGIT_PAD), jnp.float32)
                     .at[:, :NUM_LABELS].set(p["head_b2"].reshape(1, NUM_LABELS)),
    }


# ---------------- forward ----------------
@jax.jit
def bert_classifier_forward(pp, input_ids, attention_mask, token_type_ids):
    b, s = input_ids.shape
    t = b * s

    # embedding gathers stay in plain JAX (no clean Pallas equivalent at this size)
    emb = (
        pp["word_emb"][input_ids]
        + pp["pos_emb"][jnp.arange(s)][None, :, :]
        + pp["type_emb"][token_type_ids]
    ).reshape(t, HIDDEN)

    # (T, T) additive bias: -1e9 for cross-example pairs and for padded keys.
    batch_ids = jnp.repeat(jnp.arange(b), s)                     # (T,)
    key_ok = attention_mask.reshape(t) > 0                       # (T,)
    valid = (batch_ids[:, None] == batch_ids[None, :]) & key_ok[None, :]
    attn_bias = jnp.where(valid, 0.0, -1e9).astype(jnp.float32)  # (T, T)

    h3 = 3 * HIDDEN

    def layer_spec(shape):  # stacked (L, *shape) weights, one layer per grid step
        return pl.BlockSpec((None,) + shape, lambda i: (i,) + (0,) * len(shape))

    def const_spec(shape):  # layer-invariant inputs, kept resident
        return pl.BlockSpec(shape, lambda i: (0, 0))

    out = pl.pallas_call(
        _encoder_kernel,
        grid_spec=pltpu.PrefetchScalarGridSpec(
            num_scalar_prefetch=0,
            grid=(NUM_LAYERS,),
            in_specs=[
                const_spec((t, HIDDEN)),                 # emb
                const_spec((t, t)),                      # attention bias
                const_spec((1, HIDDEN)),                 # emb LN gamma
                const_spec((1, HIDDEN)),                 # emb LN beta
                layer_spec((HIDDEN, h3)),                # fused QKV weight
                layer_spec((1, h3)),                     # fused QKV bias
                layer_spec((HIDDEN, HIDDEN)),            # attn output weight
                layer_spec((1, HIDDEN)),                 # attn output bias
                layer_spec((1, HIDDEN)),                 # LN1 gamma
                layer_spec((1, HIDDEN)),                 # LN1 beta
                layer_spec((HIDDEN, INTERMEDIATE)),      # FFN w1
                layer_spec((1, INTERMEDIATE)),           # FFN b1
                layer_spec((INTERMEDIATE, HIDDEN)),      # FFN w2
                layer_spec((1, HIDDEN)),                 # FFN b2
                layer_spec((1, HIDDEN)),                 # LN2 gamma
                layer_spec((1, HIDDEN)),                 # LN2 beta
                const_spec((HIDDEN, HIDDEN)),            # head w1
                const_spec((1, HIDDEN)),                 # head b1
                const_spec((HIDDEN, LOGIT_PAD)),         # head w2 (lane-padded)
                const_spec((1, LOGIT_PAD)),              # head b2 (lane-padded)
            ],
            out_specs=pl.BlockSpec((t, LOGIT_PAD), lambda i: (0, 0)),
            scratch_shapes=[pltpu.VMEM((t, HIDDEN), jnp.float32)],  # resident hidden state
        ),
        out_shape=jax.ShapeDtypeStruct((t, LOGIT_PAD), jnp.float32),
        compiler_params=pltpu.CompilerParams(
            # sequential layer carry through VMEM scratch -> "arbitrary"
            dimension_semantics=("arbitrary",),
        ),
    )(
        emb, attn_bias, pp["emb_ln_g"], pp["emb_ln_b"],
        pp["wqkv"], pp["bqkv"], pp["wo"], pp["bo"], pp["ln1_g"], pp["ln1_b"],
        pp["w1"], pp["b1"], pp["w2"], pp["b2"], pp["ln2_g"], pp["ln2_b"],
        pp["head_w1"], pp["head_b1"], pp["head_w2"], pp["head_b2"],
    )

    # CLS rows are at token positions b*SEQ; keep the real label columns.
    return out[::s, :NUM_LABELS]


if __name__ == "__main__":
    key = jax.random.PRNGKey(0)
    kp, kid, ktt = jax.random.split(key, 3)

    params = init_params(kp)
    packed = pack_params(params)

    input_ids = jax.random.randint(kid, (BATCH, SEQ), 0, VOCAB, dtype=jnp.int32)
    # second example has 2 padding tokens at the end
    attention_mask = jnp.array([[1] * SEQ, [1] * (SEQ - 2) + [0, 0]], dtype=jnp.int32)
    token_type_ids = jax.random.randint(ktt, (BATCH, SEQ), 0, TYPE_VOCAB, dtype=jnp.int32)

    logits = bert_classifier_forward(packed, input_ids, attention_mask, token_type_ids)
    logits = jax.block_until_ready(logits)
    assert logits.shape == (BATCH, NUM_LABELS)
    print("KERNEL_OK")
</pallas_src>

<mosaic_0001>
module attributes {stable_mosaic.version = 11 : i64} {
  func.func @_encoder_kernel(%arg0: i32, %arg1: memref<16x32xf32, #tpu.memory_space<vmem>>, %arg2: memref<16x16xf32, #tpu.memory_space<vmem>>, %arg3: memref<1x32xf32, #tpu.memory_space<vmem>>, %arg4: memref<1x32xf32, #tpu.memory_space<vmem>>, %arg5: memref<1x32x96xbf16, #tpu.memory_space<vmem>>, %arg6: memref<1x1x96xf32, #tpu.memory_space<vmem>>, %arg7: memref<1x32x32xbf16, #tpu.memory_space<vmem>>, %arg8: memref<1x1x32xf32, #tpu.memory_space<vmem>>, %arg9: memref<1x1x32xf32, #tpu.memory_space<vmem>>, %arg10: memref<1x1x32xf32, #tpu.memory_space<vmem>>, %arg11: memref<1x32x64xbf16, #tpu.memory_space<vmem>>, %arg12: memref<1x1x64xf32, #tpu.memory_space<vmem>>, %arg13: memref<1x64x32xbf16, #tpu.memory_space<vmem>>, %arg14: memref<1x1x32xf32, #tpu.memory_space<vmem>>, %arg15: memref<1x1x32xf32, #tpu.memory_space<vmem>>, %arg16: memref<1x1x32xf32, #tpu.memory_space<vmem>>, %arg17: memref<32x32xbf16, #tpu.memory_space<vmem>>, %arg18: memref<1x32xf32, #tpu.memory_space<vmem>>, %arg19: memref<32x128xbf16, #tpu.memory_space<vmem>>, %arg20: memref<1x128xf32, #tpu.memory_space<vmem>>, %arg21: memref<16x128xf32, #tpu.memory_space<vmem>>, %arg22: memref<16x32xf32, #tpu.memory_space<vmem>>) attributes {dimension_semantics = [#tpu.dimension_semantics<arbitrary>], iteration_bounds = array<i64: 2>, scalar_prefetch = 0 : i64, scratch_operands = 1 : i64, tpu.core_type = #tpu.core_type<tc>, window_params = [{pipeline_mode = #tpu.pipeline_mode<synchronous>, transform_indices = @transform_0, window_bounds = array<i64: 16, 32>}, {pipeline_mode = #tpu.pipeline_mode<synchronous>, transform_indices = @transform_1, window_bounds = array<i64: 16, 16>}, {pipeline_mode = #tpu.pipeline_mode<synchronous>, transform_indices = @transform_2, window_bounds = array<i64: 1, 32>}, {pipeline_mode = #tpu.pipeline_mode<synchronous>, transform_indices = @transform_3, window_bounds = array<i64: 1, 32>}, {transform_indices = @transform_4, window_bounds = array<i64: 1, 32, 96>}, {transform_indices = @transform_5, window_bounds = array<i64: 1, 1, 96>}, {transform_indices = @transform_6, window_bounds = array<i64: 1, 32, 32>}, {transform_indices = @transform_7, window_bounds = array<i64: 1, 1, 32>}, {transform_indices = @transform_8, window_bounds = array<i64: 1, 1, 32>}, {transform_indices = @transform_9, window_bounds = array<i64: 1, 1, 32>}, {transform_indices = @transform_10, window_bounds = array<i64: 1, 32, 64>}, {transform_indices = @transform_11, window_bounds = array<i64: 1, 1, 64>}, {transform_indices = @transform_12, window_bounds = array<i64: 1, 64, 32>}, {transform_indices = @transform_13, window_bounds = array<i64: 1, 1, 32>}, {transform_indices = @transform_14, window_bounds = array<i64: 1, 1, 32>}, {transform_indices = @transform_15, window_bounds = array<i64: 1, 1, 32>}, {pipeline_mode = #tpu.pipeline_mode<synchronous>, transform_indices = @transform_16, window_bounds = array<i64: 32, 32>}, {pipeline_mode = #tpu.pipeline_mode<synchronous>, transform_indices = @transform_17, window_bounds = array<i64: 1, 32>}, {pipeline_mode = #tpu.pipeline_mode<synchronous>, transform_indices = @transform_18, window_bounds = array<i64: 32, 128>}, {pipeline_mode = #tpu.pipeline_mode<synchronous>, transform_indices = @transform_19, window_bounds = array<i64: 1, 128>}, {pipeline_mode = #tpu.pipeline_mode<synchronous>, transform_indices = @transform_20, window_bounds = array<i64: 16, 128>}]} {
    %c0_i32 = arith.constant 0 : i32
    %0 = arith.cmpi eq, %arg0, %c0_i32 : i32
    %1 = arith.extui %0 : i1 to i32
    %c0_i32_0 = arith.constant 0 : i32
    %2 = arith.cmpi ne, %1, %c0_i32_0 : i32
    scf.if %2 {
      %c0_101 = arith.constant 0 : index
      %c0_102 = arith.constant 0 : index
      %217 = vector.load %arg1[%c0_101, %c0_102] : memref<16x32xf32, #tpu.memory_space<vmem>>, vector<16x32xf32>
      %c0_103 = arith.constant 0 : index
      %c0_104 = arith.constant 0 : index
      %218 = vector.load %arg3[%c0_103, %c0_104] : memref<1x32xf32, #tpu.memory_space<vmem>>, vector<1x32xf32>
      %c0_105 = arith.constant 0 : index
      %c0_106 = arith.constant 0 : index
      %219 = vector.load %arg4[%c0_105, %c0_106] : memref<1x32xf32, #tpu.memory_space<vmem>>, vector<1x32xf32>
      %cst_107 = arith.constant dense<0.000000e+00> : vector<16xf32>
      %220 = vector.multi_reduction <add>, %217, %cst_107 [1] : vector<16x32xf32> to vector<16xf32>
      %221 = vector.shape_cast %220 : vector<16xf32> to vector<16x1xf32>
      %cst_108 = arith.constant 3.200000e+01 : f32
      %222 = vector.broadcast %cst_108 : f32 to vector<16x1xf32>
      %223 = arith.divf %221, %222 : vector<16x1xf32>
      %224 = vector.broadcast %223 : vector<16x1xf32> to vector<16x32xf32>
      %225 = arith.subf %217, %224 : vector<16x32xf32>
      %226 = arith.mulf %225, %225 : vector<16x32xf32>
      %cst_109 = arith.constant dense<0.000000e+00> : vector<16xf32>
      %227 = vector.multi_reduction <add>, %226, %cst_109 [1] : vector<16x32xf32> to vector<16xf32>
      %228 = vector.shape_cast %227 : vector<16xf32> to vector<16x1xf32>
      %cst_110 = arith.constant 3.200000e+01 : f32
      %229 = vector.broadcast %cst_110 : f32 to vector<16x1xf32>
      %230 = arith.divf %228, %229 : vector<16x1xf32>
      %cst_111 = arith.constant 9.99999996E-13 : f32
      %231 = vector.broadcast %cst_111 : f32 to vector<16x1xf32>
      %232 = arith.addf %230, %231 : vector<16x1xf32>
      %233 = math.rsqrt %232 : vector<16x1xf32>
      %234 = vector.broadcast %233 : vector<16x1xf32> to vector<16x32xf32>
      %235 = arith.mulf %225, %234 : vector<16x32xf32>
      %236 = vector.broadcast %218 : vector<1x32xf32> to vector<16x32xf32>
      %237 = arith.mulf %235, %236 : vector<16x32xf32>
      %238 = vector.broadcast %219 : vector<1x32xf32> to vector<16x32xf32>
      %239 = arith.addf %237, %238 : vector<16x32xf32>
      %c0_112 = arith.constant 0 : index
      %c0_113 = arith.constant 0 : index
      %240 = vector.load %arg22[%c0_112, %c0_113] : memref<16x32xf32, #tpu.memory_space<vmem>>, vector<16x32xf32>
      tpu.vector_store %arg22[%c0_112, %c0_113], %239 {strides = array<i32>} : memref<16x32xf32, #tpu.memory_space<vmem>>, vector<16x32xf32>,
    } else {
    }
    %c0 = arith.constant 0 : index
    %c0_1 = arith.constant 0 : index
    %3 = vector.load %arg22[%c0, %c0_1] : memref<16x32xf32, #tpu.memory_space<vmem>>, vector<16x32xf32>
    %4 = arith.truncf %3 : vector<16x32xf32> to vector<16x32xbf16>
    %c0_2 = arith.constant 0 : index
    %c0_3 = arith.constant 0 : index
    %c0_4 = arith.constant 0 : index
    %5 = vector.load %arg5[%c0_2, %c0_3, %c0_4] : memref<1x32x96xbf16, #tpu.memory_space<vmem>>, vector<1x32x96xbf16>
    %6 = vector.shape_cast %5 : vector<1x32x96xbf16> to vector<32x96xbf16>
    %cst = arith.constant dense<0.000000e+00> : vector<16x96xf32>
    %7 = tpu.matmul %4, %6, %cst {dimension_numbers = #tpu.dot_dimension_numbers<[1], [0], [0], [1], [0, 0, 1, 1], [], []>} : vector<16x32xbf16>, vector<32x96xbf16>, vector<16x96xf32> -> vector<16x96xf32>
    %c0_5 = arith.constant 0 : index
    %c0_6 = arith.constant 0 : index
    %c0_7 = arith.constant 0 : index
    %8 = vector.load %arg6[%c0_5, %c0_6, %c0_7] : memref<1x1x96xf32, #tpu.memory_space<vmem>>, vector<1x1x96xf32>
    %9 = vector.shape_cast %8 : vector<1x1x96xf32> to vector<1x96xf32>
    %10 = vector.broadcast %9 : vector<1x96xf32> to vector<16x96xf32>
    %11 = arith.addf %7, %10 : vector<16x96xf32>
    %12 = vector.extract_strided_slice %11 {offsets = [0, 0], sizes = [16, 32], strides = [1, 1]} : vector<16x96xf32> to vector<16x32xf32>
    %13 = vector.extract_strided_slice %11 {offsets = [0, 32], sizes = [16, 32], strides = [1, 1]} : vector<16x96xf32> to vector<16x32xf32>
    %14 = vector.extract_strided_slice %11 {offsets = [0, 64], sizes = [16, 32], strides = [1, 1]} : vector<16x96xf32> to vector<16x32xf32>
    %c0_8 = arith.constant 0 : index
    %c0_9 = arith.constant 0 : index
    %15 = vector.load %arg2[%c0_8, %c0_9] : memref<16x16xf32, #tpu.memory_space<vmem>>, vector<16x16xf32>
    %16 = tpu.iota {dimensions = array<i32: 1>} : vector<16x32xi32>
    %cst_10 = arith.constant 0.000000e+00 : f32
    %17 = vector.broadcast %cst_10 : f32 to vector<16x32xf32>
    %18 = vector.extract_strided_slice %12 {offsets = [0, 0], sizes = [16, 8], strides = [1, 1]} : vector<16x32xf32> to vector<16x8xf32>
    %19 = vector.extract_strided_slice %13 {offsets = [0, 0], sizes = [16, 8], strides = [1, 1]} : vector<16x32xf32> to vector<16x8xf32>
    "tpu.trace_start"() <{level = 10 : i32, message = "qd,kd->qk"}> : () -> ()
    %cst_11 = arith.constant dense<0.000000e+00> : vector<16x16xf32>
    %20 = tpu.matmul %18, %19, %cst_11 {dimension_numbers = #tpu.dot_dimension_numbers<[1], [1], [0], [0], [0, 0, 1, 0], [], []>} : vector<16x8xf32>, vector<16x8xf32>, vector<16x16xf32> -> vector<16x16xf32>
    "tpu.trace_stop"() : () -> ()
    %cst_12 = arith.constant 0.353553385 : f32
    %21 = vector.broadcast %cst_12 : f32 to vector<16x16xf32>
    %22 = arith.mulf %20, %21 : vector<16x16xf32>
    %23 = arith.addf %22, %15 : vector<16x16xf32>
    %cst_13 = arith.constant dense<0xFF800000> : vector<16xf32>
    %24 = vector.multi_reduction <maximumf>, %23, %cst_13 [1] : vector<16x16xf32> to vector<16xf32>
    %25 = vector.shape_cast %24 : vector<16xf32> to vector<16x1xf32>
    %26 = vector.broadcast %25 : vector<16x1xf32> to vector<16x16xf32>
    %27 = arith.subf %23, %26 : vector<16x16xf32>
    %28 = math.exp %27 : vector<16x16xf32>
    %cst_14 = arith.constant dense<0.000000e+00> : vector<16xf32>
    %29 = vector.multi_reduction <add>, %28, %cst_14 [1] : vector<16x16xf32> to vector<16xf32>
    %30 = vector.shape_cast %29 : vector<16xf32> to vector<16x1xf32>
    %31 = vector.broadcast %30 : vector<16x1xf32> to vector<16x16xf32>
    %32 = arith.divf %28, %31 : vector<16x16xf32>
    %c0_i32_15 = arith.constant 0 : i32
    %33 = vector.broadcast %c0_i32_15 : i32 to vector<16x32xi32>
    %34 = arith.cmpi sge, %16, %33 : vector<16x32xi32>
    %c8_i32 = arith.constant 8 : i32
    %35 = vector.broadcast %c8_i32 : i32 to vector<16x32xi32>
    %36 = arith.cmpi slt, %16, %35 : vector<16x32xi32>
    %37 = arith.andi %34, %36 : vector<16x32xi1>
    %cst_16 = arith.constant 0.000000e+00 : f32
    %38 = vector.broadcast %cst_16 : f32 to vector<16x32xf32>
    %39 = arith.select %37, %14, %38 : vector<16x32xi1>, vector<16x32xf32>
    %cst_17 = arith.constant dense<0.000000e+00> : vector<16x32xf32>
    %40 = tpu.matmul %32, %39, %cst_17 {dimension_numbers = #tpu.dot_dimension_numbers<[1], [0], [0], [1], [0, 0, 1, 1], [], []>} : vector<16x16xf32>, vector<16x32xf32>, vector<16x32xf32> -> vector<16x32xf32>
    %41 = arith.addf %17, %40 : vector<16x32xf32>
    %42 = vector.extract_strided_slice %12 {offsets = [0, 8], sizes = [16, 8], strides = [1, 1]} : vector<16x32xf32> to vector<16x8xf32>
    %43 = vector.extract_strided_slice %13 {offsets = [0, 8], sizes = [16, 8], strides = [1, 1]} : vector<16x32xf32> to vector<16x8xf32>
    "tpu.trace_start"() <{level = 10 : i32, message = "qd,kd->qk"}> : () -> ()
    %cst_18 = arith.constant dense<0.000000e+00> : vector<16x16xf32>
    %44 = tpu.matmul %42, %43, %cst_18 {dimension_numbers = #tpu.dot_dimension_numbers<[1], [1], [0], [0], [0, 0, 1, 0], [], []>} : vector<16x8xf32>, vector<16x8xf32>, vector<16x16xf32> -> vector<16x16xf32>
    "tpu.trace_stop"() : () -> ()
    %cst_19 = arith.constant 0.353553385 : f32
    %45 = vector.broadcast %cst_19 : f32 to vector<16x16xf32>
    %46 = arith.mulf %44, %45 : vector<16x16xf32>
    %47 = arith.addf %46, %15 : vector<16x16xf32>
    %cst_20 = arith.constant dense<0xFF800000> : vector<16xf32>
    %48 = vector.multi_reduction <maximumf>, %47, %cst_20 [1] : vector<16x16xf32> to vector<16xf32>
    %49 = vector.shape_cast %48 : vector<16xf32> to vector<16x1xf32>
    %50 = vector.broadcast %49 : vector<16x1xf32> to vector<16x16xf32>
    %51 = arith.subf %47, %50 : vector<16x16xf32>
    %52 = math.exp %51 : vector<16x16xf32>
    %cst_21 = arith.constant dense<0.000000e+00> : vector<16xf32>
    %53 = vector.multi_reduction <add>, %52, %cst_21 [1] : vector<16x16xf32> to vector<16xf32>
    %54 = vector.shape_cast %53 : vector<16xf32> to vector<16x1xf32>
    %55 = vector.broadcast %54 : vector<16x1xf32> to vector<16x16xf32>
    %56 = arith.divf %52, %55 : vector<16x16xf32>
    %c8_i32_22 = arith.constant 8 : i32
    %57 = vector.broadcast %c8_i32_22 : i32 to vector<16x32xi32>
    %58 = arith.cmpi sge, %16, %57 : vector<16x32xi32>
    %c16_i32 = arith.constant 16 : i32
    %59 = vector.broadcast %c16_i32 : i32 to vector<16x32xi32>
    %60 = arith.cmpi slt, %16, %59 : vector<16x32xi32>
    %61 = arith.andi %58, %60 : vector<16x32xi1>
    %cst_23 = arith.constant 0.000000e+00 : f32
    %62 = vector.broadcast %cst_23 : f32 to vector<16x32xf32>
    %63 = arith.select %61, %14, %62 : vector<16x32xi1>, vector<16x32xf32>
    %cst_24 = arith.constant dense<0.000000e+00> : vector<16x32xf32>
    %64 = tpu.matmul %56, %63, %cst_24 {dimension_numbers = #tpu.dot_dimension_numbers<[1], [0], [0], [1], [0, 0, 1, 1], [], []>} : vector<16x16xf32>, vector<16x32xf32>, vector<16x32xf32> -> vector<16x32xf32>
    %65 = arith.addf %41, %64 : vector<16x32xf32>
    %66 = vector.extract_strided_slice %12 {offsets = [0, 16], sizes = [16, 8], strides = [1, 1]} : vector<16x32xf32> to vector<16x8xf32>
    %67 = vector.extract_strided_slice %13 {offsets = [0, 16], sizes = [16, 8], strides = [1, 1]} : vector<16x32xf32> to vector<16x8xf32>
    "tpu.trace_start"() <{level = 10 : i32, message = "qd,kd->qk"}> : () -> ()
    %cst_25 = arith.constant dense<0.000000e+00> : vector<16x16xf32>
    %68 = tpu.matmul %66, %67, %cst_25 {dimension_numbers = #tpu.dot_dimension_numbers<[1], [1], [0], [0], [0, 0, 1, 0], [], []>} : vector<16x8xf32>, vector<16x8xf32>, vector<16x16xf32> -> vector<16x16xf32>
    "tpu.trace_stop"() : () -> ()
    %cst_26 = arith.constant 0.353553385 : f32
    %69 = vector.broadcast %cst_26 : f32 to vector<16x16xf32>
    %70 = arith.mulf %68, %69 : vector<16x16xf32>
    %71 = arith.addf %70, %15 : vector<16x16xf32>
    %cst_27 = arith.constant dense<0xFF800000> : vector<16xf32>
    %72 = vector.multi_reduction <maximumf>, %71, %cst_27 [1] : vector<16x16xf32> to vector<16xf32>
    %73 = vector.shape_cast %72 : vector<16xf32> to vector<16x1xf32>
    %74 = vector.broadcast %73 : vector<16x1xf32> to vector<16x16xf32>
    %75 = arith.subf %71, %74 : vector<16x16xf32>
    %76 = math.exp %75 : vector<16x16xf32>
    %cst_28 = arith.constant dense<0.000000e+00> : vector<16xf32>
    %77 = vector.multi_reduction <add>, %76, %cst_28 [1] : vector<16x16xf32> to vector<16xf32>
    %78 = vector.shape_cast %77 : vector<16xf32> to vector<16x1xf32>
    %79 = vector.broadcast %78 : vector<16x1xf32> to vector<16x16xf32>
    %80 = arith.divf %76, %79 : vector<16x16xf32>
    %c16_i32_29 = arith.constant 16 : i32
    %81 = vector.broadcast %c16_i32_29 : i32 to vector<16x32xi32>
    %82 = arith.cmpi sge, %16, %81 : vector<16x32xi32>
    %c24_i32 = arith.constant 24 : i32
    %83 = vector.broadcast %c24_i32 : i32 to vector<16x32xi32>
    %84 = arith.cmpi slt, %16, %83 : vector<16x32xi32>
    %85 = arith.andi %82, %84 : vector<16x32xi1>
    %cst_30 = arith.constant 0.000000e+00 : f32
    %86 = vector.broadcast %cst_30 : f32 to vector<16x32xf32>
    %87 = arith.select %85, %14, %86 : vector<16x32xi1>, vector<16x32xf32>
    %cst_31 = arith.constant dense<0.000000e+00> : vector<16x32xf32>
    %88 = tpu.matmul %80, %87, %cst_31 {dimension_numbers = #tpu.dot_dimension_numbers<[1], [0], [0], [1], [0, 0, 1, 1], [], []>} : vector<16x16xf32>, vector<16x32xf32>, vector<16x32xf32> -> vector<16x32xf32>
    %89 = arith.addf %65, %88 : vector<16x32xf32>
    %90 = vector.extract_strided_slice %12 {offsets = [0, 24], sizes = [16, 8], strides = [1, 1]} : vector<16x32xf32> to vector<16x8xf32>
    %91 = vector.extract_strided_slice %13 {offsets = [0, 24], sizes = [16, 8], strides = [1, 1]} : vector<16x32xf32> to vector<16x8xf32>
    "tpu.trace_start"() <{level = 10 : i32, message = "qd,kd->qk"}> : () -> ()
    %cst_32 = arith.constant dense<0.000000e+00> : vector<16x16xf32>
    %92 = tpu.matmul %90, %91, %cst_32 {dimension_numbers = #tpu.dot_dimension_numbers<[1], [1], [0], [0], [0, 0, 1, 0], [], []>} : vector<16x8xf32>, vector<16x8xf32>, vector<16x16xf32> -> vector<16x16xf32>
    "tpu.trace_stop"() : () -> ()
    %cst_33 = arith.constant 0.353553385 : f32
    %93 = vector.broadcast %cst_33 : f32 to vector<16x16xf32>
    %94 = arith.mulf %92, %93 : vector<16x16xf32>
    %95 = arith.addf %94, %15 : vector<16x16xf32>
    %cst_34 = arith.constant dense<0xFF800000> : vector<16xf32>
    %96 = vector.multi_reduction <maximumf>, %95, %cst_34 [1] : vector<16x16xf32> to vector<16xf32>
    %97 = vector.shape_cast %96 : vector<16xf32> to vector<16x1xf32>
    %98 = vector.broadcast %97 : vector<16x1xf32> to vector<16x16xf32>
    %99 = arith.subf %95, %98 : vector<16x16xf32>
    %100 = math.exp %99 : vector<16x16xf32>
    %cst_35 = arith.constant dense<0.000000e+00> : vector<16xf32>
    %101 = vector.multi_reduction <add>, %100, %cst_35 [1] : vector<16x16xf32> to vector<16xf32>
    %102 = vector.shape_cast %101 : vector<16xf32> to vector<16x1xf32>
    %103 = vector.broadcast %102 : vector<16x1xf32> to vector<16x16xf32>
    %104 = arith.divf %100, %103 : vector<16x16xf32>
    %c24_i32_36 = arith.constant 24 : i32
    %105 = vector.broadcast %c24_i32_36 : i32 to vector<16x32xi32>
    %106 = arith.cmpi sge, %16, %105 : vector<16x32xi32>
    %c32_i32 = arith.constant 32 : i32
    %107 = vector.broadcast %c32_i32 : i32 to vector<16x32xi32>
    %108 = arith.cmpi slt, %16, %107 : vector<16x32xi32>
    %109 = arith.andi %106, %108 : vector<16x32xi1>
    %cst_37 = arith.constant 0.000000e+00 : f32
    %110 = vector.broadcast %cst_37 : f32 to vector<16x32xf32>
    %111 = arith.select %109, %14, %110 : vector<16x32xi1>, vector<16x32xf32>
    %cst_38 = arith.constant dense<0.000000e+00> : vector<16x32xf32>
    %112 = tpu.matmul %104, %111, %cst_38 {dimension_numbers = #tpu.dot_dimension_numbers<[1], [0], [0], [1], [0, 0, 1, 1], [], []>} : vector<16x16xf32>, vector<16x32xf32>, vector<16x32xf32> -> vector<16x32xf32>
    %113 = arith.addf %89, %112 : vector<16x32xf32>
    %114 = arith.truncf %113 : vector<16x32xf32> to vector<16x32xbf16>
    %c0_39 = arith.constant 0 : index
    %c0_40 = arith.constant 0 : index
    %c0_41 = arith.constant 0 : index
    %115 = vector.load %arg7[%c0_39, %c0_40, %c0_41] : memref<1x32x32xbf16, #tpu.memory_space<vmem>>, vector<1x32x32xbf16>
    %116 = vector.shape_cast %115 : vector<1x32x32xbf16> to vector<32x32xbf16>
    %cst_42 = arith.constant dense<0.000000e+00> : vector<16x32xf32>
    %117 = tpu.matmul %114, %116, %cst_42 {dimension_numbers = #tpu.dot_dimension_numbers<[1], [0], [0], [1], [0, 0, 1, 1], [], []>} : vector<16x32xbf16>, vector<32x32xbf16>, vector<16x32xf32> -> vector<16x32xf32>
    %c0_43 = arith.constant 0 : index
    %c0_44 = arith.constant 0 : index
    %c0_45 = arith.constant 0 : index
    %118 = vector.load %arg8[%c0_43, %c0_44, %c0_45] : memref<1x1x32xf32, #tpu.memory_space<vmem>>, vector<1x1x32xf32>
    %119 = vector.shape_cast %118 : vector<1x1x32xf32> to vector<1x32xf32>
    %120 = vector.broadcast %119 : vector<1x32xf32> to vector<16x32xf32>
    %121 = arith.addf %117, %120 : vector<16x32xf32>
    %122 = arith.addf %121, %3 : vector<16x32xf32>
    %c0_46 = arith.constant 0 : index
    %c0_47 = arith.constant 0 : index
    %c0_48 = arith.constant 0 : index
    %123 = vector.load %arg9[%c0_46, %c0_47, %c0_48] : memref<1x1x32xf32, #tpu.memory_space<vmem>>, vector<1x1x32xf32>
    %124 = vector.shape_cast %123 : vector<1x1x32xf32> to vector<1x32xf32>
    %c0_49 = arith.constant 0 : index
    %c0_50 = arith.constant 0 : index
    %c0_51 = arith.constant 0 : index
    %125 = vector.load %arg10[%c0_49, %c0_50, %c0_51] : memref<1x1x32xf32, #tpu.memory_space<vmem>>, vector<1x1x32xf32>
    %126 = vector.shape_cast %125 : vector<1x1x32xf32> to vector<1x32xf32>
    %cst_52 = arith.constant dense<0.000000e+00> : vector<16xf32>
    %127 = vector.multi_reduction <add>, %122, %cst_52 [1] : vector<16x32xf32> to vector<16xf32>
    %128 = vector.shape_cast %127 : vector<16xf32> to vector<16x1xf32>
    %cst_53 = arith.constant 3.200000e+01 : f32
    %129 = vector.broadcast %cst_53 : f32 to vector<16x1xf32>
    %130 = arith.divf %128, %129 : vector<16x1xf32>
    %131 = vector.broadcast %130 : vector<16x1xf32> to vector<16x32xf32>
    %132 = arith.subf %122, %131 : vector<16x32xf32>
    %133 = arith.mulf %132, %132 : vector<16x32xf32>
    %cst_54 = arith.constant dense<0.000000e+00> : vector<16xf32>
    %134 = vector.multi_reduction <add>, %133, %cst_54 [1] : vector<16x32xf32> to vector<16xf32>
    %135 = vector.shape_cast %134 : vector<16xf32> to vector<16x1xf32>
    %cst_55 = arith.constant 3.200000e+01 : f32
    %136 = vector.broadcast %cst_55 : f32 to vector<16x1xf32>
    %137 = arith.divf %135, %136 : vector<16x1xf32>
    %cst_56 = arith.constant 9.99999996E-13 : f32
    %138 = vector.broadcast %cst_56 : f32 to vector<16x1xf32>
    %139 = arith.addf %137, %138 : vector<16x1xf32>
    %140 = math.rsqrt %139 : vector<16x1xf32>
    %141 = vector.broadcast %140 : vector<16x1xf32> to vector<16x32xf32>
    %142 = arith.mulf %132, %141 : vector<16x32xf32>
    %143 = vector.broadcast %124 : vector<1x32xf32> to vector<16x32xf32>
    %144 = arith.mulf %142, %143 : vector<16x32xf32>
    %145 = vector.broadcast %126 : vector<1x32xf32> to vector<16x32xf32>
    %146 = arith.addf %144, %145 : vector<16x32xf32>
    %147 = arith.truncf %146 : vector<16x32xf32> to vector<16x32xbf16>
    %c0_57 = arith.constant 0 : index
    %c0_58 = arith.constant 0 : index
    %c0_59 = arith.constant 0 : index
    %148 = vector.load %arg11[%c0_57, %c0_58, %c0_59] : memref<1x32x64xbf16, #tpu.memory_space<vmem>>, vector<1x32x64xbf16>
    %149 = vector.shape_cast %148 : vector<1x32x64xbf16> to vector<32x64xbf16>
    %cst_60 = arith.constant dense<0.000000e+00> : vector<16x64xf32>
    %150 = tpu.matmul %147, %149, %cst_60 {dimension_numbers = #tpu.dot_dimension_numbers<[1], [0], [0], [1], [0, 0, 1, 1], [], []>} : vector<16x32xbf16>, vector<32x64xbf16>, vector<16x64xf32> -> vector<16x64xf32>
    %c0_61 = arith.constant 0 : index
    %c0_62 = arith.constant 0 : index
    %c0_63 = arith.constant 0 : index
    %151 = vector.load %arg12[%c0_61, %c0_62, %c0_63] : memref<1x1x64xf32, #tpu.memory_space<vmem>>, vector<1x1x64xf32>
    %152 = vector.shape_cast %151 : vector<1x1x64xf32> to vector<1x64xf32>
    %153 = vector.broadcast %152 : vector<1x64xf32> to vector<16x64xf32>
    %154 = arith.addf %150, %153 : vector<16x64xf32>
    %cst_64 = arith.constant 5.000000e-01 : f32
    %155 = vector.broadcast %cst_64 : f32 to vector<16x64xf32>
    %156 = arith.mulf %155, %154 : vector<16x64xf32>
    %cst_65 = arith.constant 4.471500e-02 : f32
    %157 = vector.broadcast %cst_65 : f32 to vector<16x64xf32>
    %158 = arith.mulf %157, %154 : vector<16x64xf32>
    %159 = arith.mulf %158, %154 : vector<16x64xf32>
    %160 = arith.mulf %159, %154 : vector<16x64xf32>
    %161 = arith.addf %154, %160 : vector<16x64xf32>
    %cst_66 = arith.constant 0.797884583 : f32
    %162 = vector.broadcast %cst_66 : f32 to vector<16x64xf32>
    %163 = arith.mulf %162, %161 : vector<16x64xf32>
    %164 = math.tanh %163 : vector<16x64xf32>
    %cst_67 = arith.constant 1.000000e+00 : f32
    %165 = vector.broadcast %cst_67 : f32 to vector<16x64xf32>
    %166 = arith.addf %165, %164 : vector<16x64xf32>
    %167 = arith.mulf %156, %166 : vector<16x64xf32>
    %168 = arith.truncf %167 : vector<16x64xf32> to vector<16x64xbf16>
    %c0_68 = arith.constant 0 : index
    %c0_69 = arith.constant 0 : index
    %c0_70 = arith.constant 0 : index
    %169 = vector.load %arg13[%c0_68, %c0_69, %c0_70] : memref<1x64x32xbf16, #tpu.memory_space<vmem>>, vector<1x64x32xbf16>
    %170 = vector.shape_cast %169 : vector<1x64x32xbf16> to vector<64x32xbf16>
    %cst_71 = arith.constant dense<0.000000e+00> : vector<16x32xf32>
    %171 = tpu.matmul %168, %170, %cst_71 {dimension_numbers = #tpu.dot_dimension_numbers<[1], [0], [0], [1], [0, 0, 1, 1], [], []>} : vector<16x64xbf16>, vector<64x32xbf16>, vector<16x32xf32> -> vector<16x32xf32>
    %c0_72 = arith.constant 0 : index
    %c0_73 = arith.constant 0 : index
    %c0_74 = arith.constant 0 : index
    %172 = vector.load %arg14[%c0_72, %c0_73, %c0_74] : memref<1x1x32xf32, #tpu.memory_space<vmem>>, vector<1x1x32xf32>
    %173 = vector.shape_cast %172 : vector<1x1x32xf32> to vector<1x32xf32>
    %174 = vector.broadcast %173 : vector<1x32xf32> to vector<16x32xf32>
    %175 = arith.addf %171, %174 : vector<16x32xf32>
    %176 = arith.addf %175, %146 : vector<16x32xf32>
    %c0_75 = arith.constant 0 : index
    %c0_76 = arith.constant 0 : index
    %c0_77 = arith.constant 0 : index
    %177 = vector.load %arg15[%c0_75, %c0_76, %c0_77] : memref<1x1x32xf32, #tpu.memory_space<vmem>>, vector<1x1x32xf32>
    %178 = vector.shape_cast %177 : vector<1x1x32xf32> to vector<1x32xf32>
    %c0_78 = arith.constant 0 : index
    %c0_79 = arith.constant 0 : index
    %c0_80 = arith.constant 0 : index
    %179 = vector.load %arg16[%c0_78, %c0_79, %c0_80] : memref<1x1x32xf32, #tpu.memory_space<vmem>>, vector<1x1x32xf32>
    %180 = vector.shape_cast %179 : vector<1x1x32xf32> to vector<1x32xf32>
    %cst_81 = arith.constant dense<0.000000e+00> : vector<16xf32>
    %181 = vector.multi_reduction <add>, %176, %cst_81 [1] : vector<16x32xf32> to vector<16xf32>
    %182 = vector.shape_cast %181 : vector<16xf32> to vector<16x1xf32>
    %cst_82 = arith.constant 3.200000e+01 : f32
    %183 = vector.broadcast %cst_82 : f32 to vector<16x1xf32>
    %184 = arith.divf %182, %183 : vector<16x1xf32>
    %185 = vector.broadcast %184 : vector<16x1xf32> to vector<16x32xf32>
    %186 = arith.subf %176, %185 : vector<16x32xf32>
    %187 = arith.mulf %186, %186 : vector<16x32xf32>
    %cst_83 = arith.constant dense<0.000000e+00> : vector<16xf32>
    %188 = vector.multi_reduction <add>, %187, %cst_83 [1] : vector<16x32xf32> to vector<16xf32>
    %189 = vector.shape_cast %188 : vector<16xf32> to vector<16x1xf32>
    %cst_84 = arith.constant 3.200000e+01 : f32
    %190 = vector.broadcast %cst_84 : f32 to vector<16x1xf32>
    %191 = arith.divf %189, %190 : vector<16x1xf32>
    %cst_85 = arith.constant 9.99999996E-13 : f32
    %192 = vector.broadcast %cst_85 : f32 to vector<16x1xf32>
    %193 = arith.addf %191, %192 : vector<16x1xf32>
    %194 = math.rsqrt %193 : vector<16x1xf32>
    %195 = vector.broadcast %194 : vector<16x1xf32> to vector<16x32xf32>
    %196 = arith.mulf %186, %195 : vector<16x32xf32>
    %197 = vector.broadcast %178 : vector<1x32xf32> to vector<16x32xf32>
    %198 = arith.mulf %196, %197 : vector<16x32xf32>
    %199 = vector.broadcast %180 : vector<1x32xf32> to vector<16x32xf32>
    %200 = arith.addf %198, %199 : vector<16x32xf32>
    %c0_86 = arith.constant 0 : index
    %c0_87 = arith.constant 0 : index
    %201 = vector.load %arg22[%c0_86, %c0_87] : memref<16x32xf32, #tpu.memory_space<vmem>>, vector<16x32xf32>
    tpu.vector_store %arg22[%c0_86, %c0_87], %200 {strides = array<i32>} : memref<16x32xf32, #tpu.memory_space<vmem>>, vector<16x32xf32>,
    %202 = arith.truncf %200 : vector<16x32xf32> to vector<16x32xbf16>
    %c0_88 = arith.constant 0 : index
    %c0_89 = arith.constant 0 : index
    %203 = vector.load %arg17[%c0_88, %c0_89] : memref<32x32xbf16, #tpu.memory_space<vmem>>, vector<32x32xbf16>
    %cst_90 = arith.constant dense<0.000000e+00> : vector<16x32xf32>
    %204 = tpu.matmul %202, %203, %cst_90 {dimension_numbers = #tpu.dot_dimension_numbers<[1], [0], [0], [1], [0, 0, 1, 1], [], []>} : vector<16x32xbf16>, vector<32x32xbf16>, vector<16x32xf32> -> vector<16x32xf32>
    %c0_91 = arith.constant 0 : index
    %c0_92 = arith.constant 0 : index
    %205 = vector.load %arg18[%c0_91, %c0_92] : memref<1x32xf32, #tpu.memory_space<vmem>>, vector<1x32xf32>
    %206 = vector.broadcast %205 : vector<1x32xf32> to vector<16x32xf32>
    %207 = arith.addf %204, %206 : vector<16x32xf32>
    %cst_93 = arith.constant 0.000000e+00 : f32
    %208 = vector.broadcast %cst_93 : f32 to vector<16x32xf32>
    %209 = arith.maximumf %207, %208 : vector<16x32xf32>
    %210 = arith.truncf %209 : vector<16x32xf32> to vector<16x32xbf16>
    %c0_94 = arith.constant 0 : index
    %c0_95 = arith.constant 0 : index
    %211 = vector.load %arg19[%c0_94, %c0_95] : memref<32x128xbf16, #tpu.memory_space<vmem>>, vector<32x128xbf16>
    %cst_96 = arith.constant dense<0.000000e+00> : vector<16x128xf32>
    %212 = tpu.matmul %210, %211, %cst_96 {dimension_numbers = #tpu.dot_dimension_numbers<[1], [0], [0], [1], [0, 0, 1, 1], [], []>} : vector<16x32xbf16>, vector<32x128xbf16>, vector<16x128xf32> -> vector<16x128xf32>
    %c0_97 = arith.constant 0 : index
    %c0_98 = arith.constant 0 : index
    %213 = vector.load %arg20[%c0_97, %c0_98] : memref<1x128xf32, #tpu.memory_space<vmem>>, vector<1x128xf32>
    %214 = vector.broadcast %213 : vector<1x128xf32> to vector<16x128xf32>
    %215 = arith.addf %212, %214 : vector<16x128xf32>
    %c0_99 = arith.constant 0 : index
    %c0_100 = arith.constant 0 : index
    %216 = vector.load %arg21[%c0_99, %c0_100] : memref<16x128xf32, #tpu.memory_space<vmem>>, vector<16x128xf32>
    tpu.vector_store %arg21[%c0_99, %c0_100], %215 {strides = array<i32>} : memref<16x128xf32, #tpu.memory_space<vmem>>, vector<16x128xf32>,
    return
  }
  func.func @transform_0(%arg0: i32) -> (i32, i32) {
    %c0_i32 = arith.constant 0 : i32
    %c0_i32_0 = arith.constant 0 : i32
    %c0_i32_1 = arith.constant 0 : i32
    return %c0_i32, %c0_i32_0 : i32, i32
  }
  func.func @transform_1(%arg0: i32) -> (i32, i32) {
    %c0_i32 = arith.constant 0 : i32
    %c0_i32_0 = arith.constant 0 : i32
    %c0_i32_1 = arith.constant 0 : i32
    return %c0_i32, %c0_i32_0 : i32, i32
  }
  func.func @transform_2(%arg0: i32) -> (i32, i32) {
    %c0_i32 = arith.constant 0 : i32
    %c0_i32_0 = arith.constant 0 : i32
    %c0_i32_1 = arith.constant 0 : i32
    return %c0_i32, %c0_i32_0 : i32, i32
  }
  func.func @transform_3(%arg0: i32) -> (i32, i32) {
    %c0_i32 = arith.constant 0 : i32
    %c0_i32_0 = arith.constant 0 : i32
    %c0_i32_1 = arith.constant 0 : i32
    return %c0_i32, %c0_i32_0 : i32, i32
  }
  func.func @transform_4(%arg0: i32) -> (i32, i32, i32) {
    %c0_i32 = arith.constant 0 : i32
    %c0_i32_0 = arith.constant 0 : i32
    %c0_i32_1 = arith.constant 0 : i32
    return %arg0, %c0_i32, %c0_i32_0 : i32, i32, i32
  }
  func.func @transform_5(%arg0: i32) -> (i32, i32, i32) {
    %c0_i32 = arith.constant 0 : i32
    %c0_i32_0 = arith.constant 0 : i32
    %c0_i32_1 = arith.constant 0 : i32
    return %arg0, %c0_i32, %c0_i32_0 : i32, i32, i32
  }
  func.func @transform_6(%arg0: i32) -> (i32, i32, i32) {
    %c0_i32 = arith.constant 0 : i32
    %c0_i32_0 = arith.constant 0 : i32
    %c0_i32_1 = arith.constant 0 : i32
    return %arg0, %c0_i32, %c0_i32_0 : i32, i32, i32
  }
  func.func @transform_7(%arg0: i32) -> (i32, i32, i32) {
    %c0_i32 = arith.constant 0 : i32
    %c0_i32_0 = arith.constant 0 : i32
    %c0_i32_1 = arith.constant 0 : i32
    return %arg0, %c0_i32, %c0_i32_0 : i32, i32, i32
  }
  func.func @transform_8(%arg0: i32) -> (i32, i32, i32) {
    %c0_i32 = arith.constant 0 : i32
    %c0_i32_0 = arith.constant 0 : i32
    %c0_i32_1 = arith.constant 0 : i32
    return %arg0, %c0_i32, %c0_i32_0 : i32, i32, i32
  }
  func.func @transform_9(%arg0: i32) -> (i32, i32, i32) {
    %c0_i32 = arith.constant 0 : i32
    %c0_i32_0 = arith.constant 0 : i32
    %c0_i32_1 = arith.constant 0 : i32
    return %arg0, %c0_i32, %c0_i32_0 : i32, i32, i32
  }
  func.func @transform_10(%arg0: i32) -> (i32, i32, i32) {
    %c0_i32 = arith.constant 0 : i32
    %c0_i32_0 = arith.constant 0 : i32
    %c0_i32_1 = arith.constant 0 : i32
    return %arg0, %c0_i32, %c0_i32_0 : i32, i32, i32
  }
  func.func @transform_11(%arg0: i32) -> (i32, i32, i32) {
    %c0_i32 = arith.constant 0 : i32
    %c0_i32_0 = arith.constant 0 : i32
    %c0_i32_1 = arith.constant 0 : i32
    return %arg0, %c0_i32, %c0_i32_0 : i32, i32, i32
  }
  func.func @transform_12(%arg0: i32) -> (i32, i32, i32) {
    %c0_i32 = arith.constant 0 : i32
    %c0_i32_0 = arith.constant 0 : i32
    %c0_i32_1 = arith.constant 0 : i32
    return %arg0, %c0_i32, %c0_i32_0 : i32, i32, i32
  }
  func.func @transform_13(%arg0: i32) -> (i32, i32, i32) {
    %c0_i32 = arith.constant 0 : i32
    %c0_i32_0 = arith.constant 0 : i32
    %c0_i32_1 = arith.constant 0 : i32
    return %arg0, %c0_i32, %c0_i32_0 : i32, i32, i32
  }
  func.func @transform_14(%arg0: i32) -> (i32, i32, i32) {
    %c0_i32 = arith.constant 0 : i32
    %c0_i32_0 = arith.constant 0 : i32
    %c0_i32_1 = arith.constant 0 : i32
    return %arg0, %c0_i32, %c0_i32_0 : i32, i32, i32
  }
  func.func @transform_15(%arg0: i32) -> (i32, i32, i32) {
    %c0_i32 = arith.constant 0 : i32
    %c0_i32_0 = arith.constant 0 : i32
    %c0_i32_1 = arith.constant 0 : i32
    return %arg0, %c0_i32, %c0_i32_0 : i32, i32, i32
  }
  func.func @transform_16(%arg0: i32) -> (i32, i32) {
    %c0_i32 = arith.constant 0 : i32
    %c0_i32_0 = arith.constant 0 : i32
    %c0_i32_1 = arith.constant 0 : i32
    return %c0_i32, %c0_i32_0 : i32, i32
  }
  func.func @transform_17(%arg0: i32) -> (i32, i32) {
    %c0_i32 = arith.constant 0 : i32
    %c0_i32_0 = arith.constant 0 : i32
    %c0_i32_1 = arith.constant 0 : i32
    return %c0_i32, %c0_i32_0 : i32, i32
  }
  func.func @transform_18(%arg0: i32) -> (i32, i32) {
    %c0_i32 = arith.constant 0 : i32
    %c0_i32_0 = arith.constant 0 : i32
    %c0_i32_1 = arith.constant 0 : i32
    return %c0_i32, %c0_i32_0 : i32, i32
  }
  func.func @transform_19(%arg0: i32) -> (i32, i32) {
    %c0_i32 = arith.constant 0 : i32
    %c0_i32_0 = arith.constant 0 : i32
    %c0_i32_1 = arith.constant 0 : i32
    return %c0_i32, %c0_i32_0 : i32, i32
  }
  func.func @transform_20(%arg0: i32) -> (i32, i32) {
    %c0_i32 = arith.constant 0 : i32
    %c0_i32_0 = arith.constant 0 : i32
    %c0_i32_1 = arith.constant 0 : i32
    return %c0_i32, %c0_i32_0 : i32, i32
  }
}

</mosaic_0001>

<bundles_post_ra>
// kernel: bert_classifier_forward.1
= control target key start
LH: loop header
LB: loop body
LE: loop exit
PB: predicated region body
PF: predicated region fallthrough
CT: control target
= control target key end

     0   :  { %s3197_s0 = inlined_call_operand.vmem [shape: f32[16,32], index: 0, kind: input, shape index: {}]   ;;  %s3198_s1 = inlined_call_operand.vmem [shape: f32[16,16], index: 1, kind: input, shape index: {}]   ;;  %s3199_s2 = inlined_call_operand.vmem [shape: f32[1,32], index: 2, kind: input, shape index: {}]   ;;  %s3200_s3 = inlined_call_operand.vmem [shape: f32[1,32], index: 3, kind: input, shape index: {}]   ;;  %s3201_s4 = inlined_call_operand.vmem [shape: bf16[2,32,96], index: 4, kind: input, shape index: {}]   ;;  %s3202_s5 = inlined_call_operand.vmem [shape: f32[2,1,96], index: 5, kind: input, shape index: {}]   ;;  %s3203_s6 = inlined_call_operand.vmem [shape: bf16[2,32,32], index: 6, kind: input, shape index: {}]   ;;  %s3204_s7 = inlined_call_operand.vmem [shape: f32[2,1,32], index: 7, kind: input, shape index: {}]   ;;  %s3205_s8 = inlined_call_operand.vmem [shape: f32[2,1,32], index: 8, kind: input, shape index: {}]   ;;  %s3206_s9 = inlined_call_operand.vmem [shape: f32[2,1,32], index: 9, kind: input, shape index: {}]   ;;  %s3207_s10 = inlined_call_operand.vmem [shape: bf16[2,32,64], index: 10, kind: input, shape index: {}]   ;;  %s3208_s11 = inlined_call_operand.vmem [shape: f32[2,1,64], index: 11, kind: input, shape index: {}]   ;;  %s3209_s12 = inlined_call_operand.vmem [shape: bf16[2,64,32], index: 12, kind: input, shape index: {}]   ;;  %s3210_s13 = inlined_call_operand.vmem [shape: f32[2,1,32], index: 13, kind: input, shape index: {}]   ;;  %s3211_s14 = inlined_call_operand.vmem [shape: f32[2,1,32], index: 14, kind: input, shape index: {}]   ;;  %s3212_s15 = inlined_call_operand.vmem [shape: f32[2,1,32], index: 15, kind: input, shape index: {}]   ;;  %s3213_s16 = inlined_call_operand.vmem [shape: bf16[32,32], index: 16, kind: input, shape index: {}]   ;;  %s3214_s17 = inlined_call_operand.vmem [shape: f32[1,32], index: 17, kind: input, shape index: {}]   ;;  %s3215_s18 = inlined_call_operand.vmem [shape: bf16[32,128], index: 18, kind: input, shape index: {}]   ;;  %s3216_s19 = inlined_call_operand.vmem [shape: f32[1,128], index: 19, kind: input, shape index: {}]   ;;  %s3217_s20 = inlined_call_operand.vmem [shape: f32[16,128], index: 20, kind: output, shape index: {}]  }
   0x1   :  { %3224 = sst [smem:[#allocation4_spill]] %s3197_s0 }
   0x2   :  { %3225 = sst [smem:[#allocation5_spill]] %s3198_s1  ;;  %s2874_s1 = smov 0  }
   0x3   :  { %3226 = sst [smem:[#allocation6_spill]] %s3199_s2 }
   0x4   :  { %3227 = sst [smem:[#allocation7_spill]] %s3200_s3 }
   0x5   :  { %3228 = sst [smem:[#allocation8_spill]] %s3201_s4 }
   0x6   :  { %3229 = sst [smem:[#allocation9_spill]] %s3203_s6 }
   0x7   :  { %3230 = sst [smem:[#allocation10_spill]] %s3213_s16 }
   0x8   :  { %3231 = sst [smem:[#allocation11_spill]] %s3214_s17 }
   0x9   :  { %3232 = sst [smem:[#allocation12_spill]] %s3215_s18 }
   0xa   :  { %3233 = sst [smem:[#allocation13_spill]] %s3216_s19 }
   0xb   :  { %3234 = sst [smem:[#allocation14_spill]] %s3217_s20 }
   0xc LB: > { %3235 = sst [smem:[#allocation3_spill]] %s2757_s1  ;;  %s2349_s22 = sadd.s32 4294967295, %s2757_s1   ;;  %s2757_s1 = sphi %s2874_s1, %s30_s1  }
   0xd   : > { %p2352_p0 = scmp.ge.s32.totalorder %s2757_s1, 1  ;;  %p651_p1 = scmp.lt.s32.totalorder %s2757_s1, 3 }
   0xf   : > { %p652_p2 = pnand %p2352_p0, %p651_p1 }
  0x10   : > { %p743_p3 = scmp.lt.s32.totalorder (!%p652_p2), %s2349_s22, 1  ;;  %s3236_s28 = sld [smem:[#allocation8_spill]] (!%p652_p2) }
  0x11   : > { %655 = sbr.rel (%p652_p2) target bundleno = 3765 (0xeb5), region = 100  ;;  %s3237_s6 = sld [smem:[#allocation9_spill]] (!%p652_p2) }
  0x12   : > { %p2361_p4 = scmp.ne.s32.totalorder (!%p652_p2), %s2349_s22, 0 }
  0x18   : > { %s2882_s23 = scalar_select %p743_p3, %s2349_s22, 1 }
  0x19   : > { %791 = sbr.rel (%p2361_p4) target bundleno = 355 (0x163), region = 104  ;;  %vm796_vm0 = vcmask (!%p2361_p4), 261120   ;;  %s3239_s21 = sld [smem:[#allocation6_spill]] (!%p2361_p4) }
  0x1a   : > { %s2428_s24 = sshll.u32 %s2882_s23, 4  ;;  %s2431_s16 = sshll.u32 %s2882_s23, 5 }
  0x1b   : > { %s2892_s4 = scalar_lea.vmem %s3236_s28, %s2428_s24  ;;  %s2897_s0 = scalar_lea.vmem %s3237_s6, %s2428_s24 }
  0x1c   : > { %s2914_s28 = scalar_lea.vmem %s3207_s10, %s2428_s24  ;;  %s2924_s20 = scalar_lea.vmem %s3209_s12, %s2431_s16 }
  0x1d   : > { %s780_s2 = scalar_lea.vmem %s3210_s13, %s2882_s23  ;;  %s783_s26 = scalar_lea.vmem %s3211_s14, %s2882_s23 }
  0x1e   : > { %s786_s18 = scalar_lea.vmem %s3212_s15, %s2882_s23  ;;  %s3238_s6 = sld [smem:[#allocation4_spill]] (!%p2361_p4) }
  0x1f   : > { %v2362_v21 = vld [vmem:[%s3239_s21] ss:$0 sm:$0xff] (!%p2361_p4)  ;;  %s3240_s25 = sld [smem:[#allocation7_spill]] (!%p2361_p4) }
  0x24   : > { %v792_v0 = vld [vmem:[%s3238_s6] sm:$0xff]  ;;  %v793_v1 = vld [vmem:[%s3238_s6 + $0x8] sm:$0xff] }
  0x25   : > { %v797_v2 = vsel %vm796_vm0, %v792_v0, 0.0  ;;  %v800_v3 = vsel %vm796_vm0, %v793_v1, 0.0  ;;  %v2363_v23 = vld [vmem:[%s3240_s25] ss:$0 sm:$0xff] }
  0x26   : > { %798 = vadd.xlane.f32.xlu0 %v797_v2 }
  0x2a   : > { %801 = vadd.xlane.f32.xlu0 %v800_v3 }
  0xb3   : > { %v799_v4 = vpop.xlane.xlu0 %798 }
  0xb4   : > { %v804_v5 = vmul.f32 0.03125, %v799_v4 }
  0xb6   : > { %v806_v6 = vsub.f32 %v792_v0, %v804_v5 }
  0xb7   : > { %v802_v7 = vpop.xlane.xlu0 %801 }
  0xb8   : > { %v805_v8 = vmul.f32 0.03125, %v802_v7  ;;  %v808_v9 = vmul.f32 %v806_v6, %v806_v6 }
  0xba   : > { %v807_v10 = vsub.f32 %v793_v1, %v805_v8  ;;  %v810_v11 = vsel %vm796_vm0, %v808_v9, 0.0 }
  0xbb   : > { %811 = vadd.xlane.f32.xlu1 %v810_v11 }
  0xbc   : > { %v809_v12 = vmul.f32 %v807_v10, %v807_v10 }
  0xbe   : > { %v813_v13 = vsel %vm796_vm0, %v809_v12, 0.0 }
  0xbf   : > { %814 = vadd.xlane.f32.xlu1 %v813_v13 }
 0x148   : > { %v812_v14 = vpop.xlane.xlu1 %811 }
 0x149   : > { %v816_v15 = vmul.f32 0.03125, %v812_v14 }
 0x14b   : > { %v818_v16 = vadd.f32 1e-12, %v816_v15 }
 0x14c   : > { %v815_v17 = vpop.xlane.xlu1 %814 }
 0x14d   : > { %2664 = vrsqrt.f32 %v818_v16  ;;  %v817_v18 = vmul.f32 0.03125, %v815_v17 }
 0x14f   : > { %v819_v19 = vadd.f32 1e-12, %v817_v18 }
 0x151   : > { %2666 = vrsqrt.f32 %v819_v19 }
 0x157   : > { %v2665_v20 = vpop.eup %2664 }
 0x158   : > { %v822_v22 = vmul.f32 %v2665_v20, %v806_v6 }
 0x15a   : > { %v830_v24 = vmul.f32 %v2362_v21, %v822_v22 }
 0x15b   : > { %v2667_v25 = vpop.eup %2666 }
 0x15c   : > { %v838_v26 = vadd.f32 %v2363_v23, %v830_v24  ;;  %v823_v27 = vmul.f32 %v2667_v25, %v807_v10 }
 0x15e   : > { %840 = vst.msk [vmem:[#allocation2] sm:$0xff] %vm796_vm0, %v838_v26  ;;  %v831_v28 = vmul.f32 %v2362_v21, %v823_v27 }
 0x160   : > { %v839_v29 = vadd.f32 %v2363_v23, %v831_v28 }
 0x162   : > { %841 = vst.msk [vmem:[#allocation2 + $0x8] sm:$0xff] %vm796_vm0, %v839_v29 }
 0x163 PF: > { %v2693_v30 = vld [vmem:[%s2892_s4] sm:$0xff]   ;;  %v2759_v31 = vmov 0.0   ;;  %v2694_v32 = vld [vmem:[%s2892_s4 + $0x8] sm:$0xff]   ;;  %vm2760_vm1 = vmmov 0   ;;  %vm868_vm2 = vcmask 261120   ;;  %s3241_s4 = scalar_lea.vmem %s3202_s5, %s2882_s23  ;;  %vm923_vm3 = vcmask 64512   ;;  %s3251_s21 = scalar_lea.vmem %s3206_s9, %s2882_s23 }
 0x164   : > { %2484 = vmatprep.subr.bf16.mxu0 %v2759_v31  ;;  %2488 = vmatprep.mubr.msk.bf16.mxu0 %vm2760_vm1, %v2759_v31  ;;  %v2364_v36 = vld [vmem:[%s3241_s4] ss:$0 sm:$0xff]  ;;  %s2761_s29 = smov 120   ;;  %s2762_s30 = smov 88   ;;  %vm2994_vm4 = vmpackc.low %vm923_vm3, %vm923_vm3  ;;  %vm1011_vm5 = vcmask 130048  }
 0x165   : > { %2485 = vmatpush3.bf16.msra.mxu0 %v2693_v30  ;;  %v2961_v33 = vld [vmem:[#allocation2] sm:$0xff]  ;;  %s2763_s16 = smov 112   ;;  %s2764_s1 = smov 96  }
 0x166   : > { %2486 = vmatprep.subr.bf16.mxu0 %v2759_v31  ;;  %s2765_s22 = smov 80   ;;  %s3244_s17 = sld [smem:[#allocation5_spill]] }
 0x167   : > { %s2766_s24 = smov 72   ;;  %s2767_s27 = smov 104  }
 0x168   : > { %s2768_s4 = smov 64  }
 0x169   : > { %v2963_v34 = vld [vmem:[#allocation2 + $0x8] sm:$0xff]  ;;  %2487 = vmatpush3.bf16.msra.mxu0 %v2694_v32 }
 0x16a   : > { %v844_v35 = vpack.c.bf16 %v2963_v34, %v2961_v33 }
 0x16c   : > { %2489 = vmatmul.mubr.msk.bf16.vlgmr.msra.gmra.mrb[0].mxu0 %vm868_vm2, %v844_v35  ;;  %v3021_v62 = vld [vmem:[%s3244_s17 + $0x8] sm:$0xff]  ;;  %v3026_v1 = vld [vmem:[%s3244_s17] sm:$0xff] }
 0x23f   : > { %v906_v37 = vpop.f32.mrb[0].mxu0 }
 0x240   : > { %v2974_v38 = vadd.f32 %v2364_v36, %v906_v37  ;;  %v2490_v39 = vpop.f32.mrb[1].mxu0 }
 0x241   : > { %v909_v40 = vpop.f32.mrb[2].mxu0 }
 0x242   : > { %v2976_v41 = vadd.f32 %v2364_v36, %v909_v40  ;;  %1045 = vrot.lane.b32.xlu1 %v2974_v38, %s2761_s29  ;;  %v2491_v42 = vpop.f32.mrb[3].mxu0  ;;  %2496 = vmatprep.mubr.msk.f32.mxu1 %vm923_vm3, %v2974_v38 }
 0x244   : > { %v2983_v43 = vpack.i.bf16 %v2976_v41, %v2974_v38 }
 0x246   : > { %1047 = vrot.lane.b32.xlu1 %v2976_v41, %s2761_s29  ;;  %2669 = vrot.lane.b32.xlu0 %v2983_v43, %s2762_s30  ;;  %s3253_s29 = sld [smem:[#allocation10_spill]] }
 0x24a   : > { %1329 = vrot.lane.b32.xlu1 %v2974_v38, %s2763_s16  ;;  %2674 = vrot.lane.b32.xlu0 %v2983_v43, %s2764_s1 }
 0x24e   : > { %2679 = vrot.lane.b32.xlu0 %v2983_v43, %s2765_s22  ;;  %s3250_s22 = scalar_lea.vmem %s3205_s8, %s2882_s23 }
 0x252   : > { %1331 = vrot.lane.b32.xlu0 %v2976_v41, %s2763_s16  ;;  %s3249_s16 = scalar_lea.vmem %s3204_s7, %s2882_s23 }
 0x2b4   : > { %v1046_v44 = vpop.permute.xlu1 %1045 }
 0x2b5   : > { %2503 = vmatprep.mubr.msk.f32.mxu0 %vm923_vm3, %v1046_v44 }
 0x2b8   : > { %v2670_v45 = vpop.permute.xlu0 %2669  ;;  %v1048_v53 = vpop.permute.xlu1 %1047 }
 0x2b9   : > { %v2672_v46 = vunpack.i.h.bf16 %v2670_v45  ;;  %v2671_v47 = vunpack.i.l.bf16 %v2670_v45 }
 0x2bb   : > { %v2598_v49 = vpack.c.bf16 %v2672_v46, %v2671_v47 }
 0x2bc   : > { %v2675_v50 = vpop.permute.xlu0 %2674  ;;  %v1330_v59 = vpop.permute.xlu1 %1329 }
 0x2bd   : > { %v2677_v51 = vunpack.i.h.bf16 %v2675_v50  ;;  %v2676_v52 = vunpack.i.l.bf16 %v2675_v50  ;;  %2600 = vmatprep.subr.msk.bf16.mxu0 %vm2994_vm4, %v2598_v49 }
 0x2be   : > { %2603 = vmatpush3.bf16.xpose.msk.msra.mxu0 %vm2994_vm4, %v2598_v49 }
 0x2bf   : > { %v2592_v54 = vpack.c.bf16 %v2677_v51, %v2676_v52 }
 0x2c0   : > { %v2680_v55 = vpop.permute.xlu0 %2679 }
 0x2c1   : > { %v2682_v56 = vunpack.i.h.bf16 %v2680_v55  ;;  %v2681_v57 = vunpack.i.l.bf16 %v2680_v55  ;;  %2594 = vmatprep.subr.msk.bf16.mxu1 %vm2994_vm4, %v2592_v54 }
 0x2c2   : > { %2597 = vmatpush3.bf16.xpose.msk.msra.mxu1 %vm2994_vm4, %v2592_v54 }
 0x2c3   : > { %v2616_v58 = vpack.c.bf16 %v2682_v56, %v2681_v57 }
 0x2c4   : > { %v1332_v60 = vpop.permute.xlu0 %1331 }
 0x2c5   : > { %2504 = vmatmul.mubr.msk.f32.vlgmr.msra.gmra.mrb[4].mxu0 %vm923_vm3, %v1048_v53  ;;  %2618 = vmatprep.subr.msk.bf16.mxu0 %vm2994_vm4, %v2616_v58 }
 0x2c6   : > { %2621 = vmatpush3.bf16.xpose.msk.msra.mxu0 %vm2994_vm4, %v2616_v58  ;;  %2524 = vmatprep.mubr.msk.f32.mxu0 %vm923_vm3, %v1330_v59 }
 0x2c7   : > { %2548 = vmatprep.subr.bf16.mxu0 %v2759_v31 }
 0x2c9   : > { %2497 = vmatmul.mubr.msk.f32.vlgmr.msra.gmra.mrb[0].mxu1 %vm923_vm3, %v2976_v41 }
 0x2cd   : > { %2525 = vmatmul.mubr.msk.f32.vlgmr.msra.gmra.mrb[6].mxu0 %vm923_vm3, %v1332_v60 }
 0x2ce   : > { %2552 = vmatprep.mubr.msk.bf16.mxu0 %vm2760_vm1, %v2759_v31 }
 0x398   : > { %v2505_v61 = vpop.f32.mrb[4].mxu0 }
 0x399   : > { %v1137_v63 = vmul.f32 0.35355338, %v2505_v61  ;;  %v1127_v0 = vpop.f32.mrb[5].mxu0  ;;  %v915_v61 = vlaneseq }
 0x39a   : > { %v1136_v2 = vmul.f32 0.35355338, %v1127_v0 }
 0x39b   : > { %v1139_v3 = vadd.f32 %v1137_v63, %v3021_v62 }
 0x39c   : > { %v2498_v4 = vpop.f32.mrb[0].mxu1  ;;  %v1138_v5 = vadd.f32 %v1136_v2, %v3026_v1  ;;  %v916_v2 = vand.u32 127, %v915_v61 }
 0x39d   : > { %v1008_v6 = vmul.f32 0.35355338, %v2498_v4  ;;  %v998_v7 = vpop.f32.mrb[1].mxu1  ;;  %v1143_v8 = vsel %vm1011_vm5, %v1139_v3, -inf }
 0x39e   : > { %v1007_v9 = vmul.f32 0.35355338, %v998_v7  ;;  %1144 = vmax.xlane.f32.xlu0 %v1143_v8  ;;  %v1140_v10 = vsel %vm1011_vm5, %v1138_v5, -inf  ;;  %vm1162_vm6 = vcmp.ge.s32.totalorder %v916_v2, 8  ;;  %vm1163_vm7 = vcmp.lt.s32.totalorder %v916_v2, 16 }
 0x39f   : > { %1141 = vmax.xlane.f32.xlu1 %v1140_v10  ;;  %v1010_v11 = vadd.f32 %v1008_v6, %v3021_v62  ;;  %vm3056_vm8 = vmand %vm1162_vm6, %vm1163_vm7  ;;  %vm1035_vm9 = vcmp.lt.s32.totalorder %v916_v2, 8  ;;  %vm1446_vm11 = vcmp.ge.s32.totalorder %v916_v2, 16  ;;  %vm1447_vm12 = vcmp.lt.s32.totalorder %v916_v2, 24 }
 0x3a0   : > { %v2526_v12 = vpop.f32.mrb[6].mxu0  ;;  %v1009_v13 = vadd.f32 %v1007_v9, %v3026_v1  ;;  %vm2605_vm10 = vmpackc.low %vm3056_vm8, %vm3056_vm8  ;;  %vm1651_vm0 = vcmp.ge.s32.totalorder %v916_v2, 24  ;;  %vm1652_vm6 = vcmp.lt.s32.totalorder %v916_v2, 32 }
 0x3a1   : > { %v1421_v14 = vmul.f32 0.35355338, %v2526_v12  ;;  %v1411_v15 = vpop.f32.mrb[7].mxu0  ;;  %v1015_v16 = vsel %vm1011_vm5, %v1010_v11, -inf  ;;  %vm2611_vm13 = vmpackc.low %vm1035_vm9, %vm1035_vm9 }
 0x3a2   : > { %v1420_v17 = vmul.f32 0.35355338, %v1411_v15  ;;  %v1012_v18 = vsel %vm1011_vm5, %v1009_v13, -inf  ;;  %vm3064_vm14 = vmand %vm1446_vm11, %vm1447_vm12 }
 0x3a3   : > { %1013 = vmax.xlane.f32.xlu0 %v1012_v18  ;;  %1016 = vmax.xlane.f32.xlu1 %v1015_v16  ;;  %v1423_v19 = vadd.f32 %v1421_v14, %v3021_v62  ;;  %vm2623_vm15 = vmpackc.low %vm3064_vm14, %vm3064_vm14 }
 0x3a4   : > { %v1422_v20 = vadd.f32 %v1420_v17, %v3026_v1  ;;  %vm1653_vm7 = vmand %vm1651_vm0, %vm1652_vm6 }
 0x3a5   : > { %v1427_v21 = vsel %vm1011_vm5, %v1423_v19, -inf  ;;  %vm2635_vm8 = vmpackc.low %vm1653_vm7, %vm1653_vm7 }
 0x3a6   : > { %v1424_v22 = vsel %vm1011_vm5, %v1422_v20, -inf }
 0x3a7   : > { %1425 = vmax.xlane.f32.xlu0 %v1424_v22  ;;  %1428 = vmax.xlane.f32.xlu1 %v1427_v21 }
 0x42b   : > { %v1145_v23 = vpop.xlane.xlu0 %1144 }
 0x42c   : > { %v1147_v24 = vsub.f32 %v1139_v3, %v1145_v23  ;;  %v1142_v25 = vpop.xlane.xlu1 %1141 }
 0x42d   : > { %v1146_v26 = vsub.f32 %v1138_v5, %v1142_v25 }
 0x42e   : > { %v1150_v27 = vmul.f32 1.442695, %v1147_v24 }
 0x42f   : > { %v1148_v28 = vmul.f32 1.442695, %v1146_v26 }
 0x430   : > { %2707 = vpow2.f32 %v1150_v27  ;;  %v1014_v29 = vpop.xlane.xlu0 %1013  ;;  %v1017_v30 = vpop.xlane.xlu1 %1016 }
 0x431   : > { %2709 = vpow2.f32 %v1148_v28  ;;  %v1018_v32 = vsub.f32 %v1009_v13, %v1014_v29  ;;  %v1019_v35 = vsub.f32 %v1010_v11, %v1017_v30 }
 0x433   : > { %v1020_v36 = vmul.f32 1.442695, %v1018_v32  ;;  %v1022_v37 = vmul.f32 1.442695, %v1019_v35 }
 0x434   : > { %v1426_v39 = vpop.xlane.xlu0 %1425  ;;  %v1429_v40 = vpop.xlane.xlu1 %1428 }
 0x435   : > { %2711 = vpow2.f32 %v1020_v36  ;;  %v1430_v42 = vsub.f32 %v1422_v20, %v1426_v39  ;;  %v1431_v44 = vsub.f32 %v1423_v19, %v1429_v40 }
 0x436   : > { %2713 = vpow2.f32 %v1022_v37 }
 0x437   : > { %v1432_v45 = vmul.f32 1.442695, %v1430_v42  ;;  %v1434_v46 = vmul.f32 1.442695, %v1431_v44 }
 0x439   : > { %2715 = vpow2.f32 %v1432_v45 }
 0x43a   : > { %v2708_v47 = vpop.eup %2707  ;;  %2717 = vpow2.f32 %v1434_v46 }
 0x43b   : > { %v2710_v49 = vpop.eup %2709  ;;  %v1155_v50 = vsel %vm1011_vm5, %v2708_v47, 0.0 }
 0x43c   : > { %1156 = vadd.xlane.f32.xlu1 %v1155_v50  ;;  %v1152_v51 = vsel %vm1011_vm5, %v2710_v49, 0.0 }
 0x43d   : > { %1153 = vadd.xlane.f32.xlu0 %v1152_v51 }
 0x43f   : > { %v2712_v52 = vpop.eup %2711 }
 0x440   : > { %v3042_v53 = vpop.eup %2713  ;;  %v1024_v54 = vsel %vm1011_vm5, %v2712_v52, 0.0 }
 0x441   : > { %1025 = vadd.xlane.f32.xlu0 %v1024_v54  ;;  %v1027_v55 = vsel %vm1011_vm5, %v3042_v53, 0.0 }
 0x442   : > { %1028 = vadd.xlane.f32.xlu1 %v1027_v55 }
 0x443   : > { %v2716_v56 = vpop.eup %2715 }
 0x444   : > { %v3047_v57 = vpop.eup %2717  ;;  %v1436_v58 = vsel %vm1011_vm5, %v2716_v56, 0.0 }
 0x445   : > { %1437 = vadd.xlane.f32.xlu0 %v1436_v58  ;;  %v1439_v59 = vsel %vm1011_vm5, %v3047_v57, 0.0 }
 0x446   : > { %1440 = vadd.xlane.f32.xlu1 %v1439_v59 }
 0x457   : > { %2689 = vrot.lane.b32.xlu1 %v2983_v43, %s2766_s24  ;;  %s3252_s24 = scalar_lea.vmem %s3208_s11, %s2882_s23 }
 0x45b   : > { %1534 = vrot.lane.b32.xlu1 %v2974_v38, %s2767_s27  ;;  %2684 = vrot.lane.b32.xlu0 %v2983_v43, %s2768_s4 }
 0x45f   : > { %1536 = vrot.lane.b32.xlu0 %v2976_v41, %s2767_s27 }
 0x4c9   : > { %v1157_v63 = vpop.xlane.xlu1 %1156 }
 0x4ca   : > { %v1154_v60 = vpop.xlane.xlu0 %1153 }
 0x4cb   : > { %2719 = vrcp.f32 %v1154_v60  ;;  %v2400_v60 = vld [vmem:[%s3249_s16] ss:$0 sm:$0xff]  ;;  %s3257_s16 = sld [smem:[#allocation14_spill]] }
 0x4cc   : > { %2721 = vrcp.f32 %v1157_v63 }
 0x4ce   : > { %v1026_v0 = vpop.xlane.xlu0 %1025 }
 0x4cf   : > { %2723 = vrcp.f32 %v1026_v0  ;;  %v1029_v4 = vpop.xlane.xlu1 %1028 }
 0x4d0   : > { %2725 = vrcp.f32 %v1029_v4 }
 0x4d2   : > { %v1438_v3 = vpop.xlane.xlu0 %1437 }
 0x4d3   : > { %2727 = vrcp.f32 %v1438_v3  ;;  %v1441_v10 = vpop.xlane.xlu1 %1440 }
 0x4d4   : > { %2729 = vrcp.f32 %v1441_v10 }
 0x4d5   : > { %v2720_v5 = vpop.eup %2719 }
 0x4d6   : > { %v2685_v43 = vpop.permute.xlu0 %2684  ;;  %v1159_v6 = vmul.f32 %v2720_v5, %v2710_v49  ;;  %v2722_v9 = vpop.eup %2721  ;;  %v2695_v49 = vld [vmem:[%s2897_s0] sm:$0xff]  }
 0x4d7   : > { %v2687_v41 = vunpack.i.h.bf16 %v2685_v43  ;;  %v2686_v7 = vunpack.i.l.bf16 %v2685_v43  ;;  %v1161_v13 = vmul.f32 %v2722_v9, %v2708_v47  ;;  %v2690_v15 = vpop.permute.xlu1 %2689  ;;  %2549 = vmatpush3.bf16.msra.mxu0 %v2695_v49 }
 0x4d8   : > { %2510 = vmatprep.mubr.msk.f32.mxu1 %vm1011_vm5, %v1159_v6  ;;  %v2692_v18 = vunpack.i.h.bf16 %v2690_v15  ;;  %v2691_v19 = vunpack.i.l.bf16 %v2690_v15  ;;  %2550 = vmatprep.subr.bf16.mxu0 %v2759_v31  ;;  %v2698_v15 = vld [vmem:[%s2914_s28 + $0x8] sm:$0xff]  }
 0x4d9   : > { %v2604_v8 = vpack.c.bf16 %v2687_v41, %v2686_v7  ;;  %v2724_v11 = vpop.eup %2723 }
 0x4da   : > { %v1031_v14 = vmul.f32 %v2724_v11, %v2712_v52  ;;  %v2726_v16 = vpop.eup %2725  ;;  %v2628_v22 = vpack.c.bf16 %v2692_v18, %v2691_v19  ;;  %v1537_v26 = vpop.permute.xlu0 %1536 }
 0x4db   : > { %2606 = vmatprep.subr.msk.bf16.mxu1 %vm2605_vm10, %v2604_v8  ;;  %v1033_v20 = vmul.f32 %v2726_v16, %v3042_v53  ;;  %v1535_v25 = vpop.permute.xlu1 %1534 }
 0x4dc   : > { %2609 = vmatpush3.bf16.msk.msra.mxu1 %vm2605_vm10, %v2604_v8 }
 0x4dd   : > { %2612 = vmatprep.subr.msk.bf16.mxu1 %vm2611_vm13, %v2604_v8  ;;  %v2728_v17 = vpop.eup %2727 }
 0x4de   : > { %v1443_v21 = vmul.f32 %v2728_v17, %v2716_v56  ;;  %v2730_v23 = vpop.eup %2729  ;;  %v2696_v56 = vld [vmem:[%s2897_s0 + $0x8] sm:$0xff]  }
 0x4df   : > { %2511 = vmatmul.mubr.msk.f32.vlgmr.msra.gmra.mrb[2].mxu1 %vm1011_vm5, %v1161_v13  ;;  %v1445_v24 = vmul.f32 %v2730_v23, %v3047_v57  ;;  %2551 = vmatpush3.bf16.msra.mxu0 %v2696_v56  ;;  %v2404_v23 = vld [vmem:[%s3250_s22] ss:$0 sm:$0xff] }
 0x4e0   : > { %2615 = vmatpush3.bf16.msk.msra.mxu1 %vm2611_vm13, %v2604_v8  ;;  %2517 = vmatprep.mubr.msk.f32.mxu1 %vm1011_vm5, %v1031_v14 }
 0x4e1   : > { %2624 = vmatprep.subr.msk.bf16.mxu1 %vm2623_vm15, %v2604_v8  ;;  %2556 = vmatprep.subr.bf16.mxu0 %v2759_v31 }
 0x4e7   : > { %2518 = vmatmul.mubr.msk.f32.vlgmr.msra.gmra.mrb[2].mxu1 %vm1011_vm5, %v1033_v20 }
 0x4e8   : > { %2627 = vmatpush3.bf16.msk.msra.mxu1 %vm2623_vm15, %v2604_v8  ;;  %2531 = vmatprep.mubr.msk.f32.mxu1 %vm1011_vm5, %v1443_v21 }
 0x4e9   : > { %2630 = vmatprep.subr.msk.bf16.mxu1 %vm2994_vm4, %v2628_v22 }
 0x4ef   : > { %2532 = vmatmul.mubr.msk.f32.vlgmr.msra.gmra.mrb[2].mxu1 %vm1011_vm5, %v1445_v24 }
 0x4f0   : > { %2538 = vmatprep.mubr.msk.f32.mxu1 %vm923_vm3, %v1535_v25 }
 0x4f1   : > { %2633 = vmatpush3.bf16.xpose.msk.msra.mxu1 %vm2994_vm4, %v2628_v22 }
 0x4f2   : > { %2636 = vmatprep.subr.msk.bf16.mxu1 %vm2635_vm8, %v2604_v8 }
 0x4f8   : > { %2539 = vmatmul.mubr.msk.f32.vlgmr.msra.gmra.mrb[4].mxu1 %vm923_vm3, %v1537_v26  ;;  %vm1980_vm3 = vcmask 523264  }
 0x4f9   : > { %2639 = vmatpush3.bf16.msk.msra.mxu1 %vm2635_vm8, %v2604_v8 }
 0x4fa   : > { %2564 = vmatprep.subr.bf16.mxu1 %v2759_v31 }
 0x5cb   : > { %v2540_v27 = vpop.f32.mrb[4].mxu1 }
 0x5cc   : > { %v1626_v28 = vmul.f32 0.35355338, %v2540_v27  ;;  %v1616_v29 = vpop.f32.mrb[5].mxu1 }
 0x5cd   : > { %v1625_v30 = vmul.f32 0.35355338, %v1616_v29 }
 0x5ce   : > { %v1628_v32 = vadd.f32 %v1626_v28, %v3021_v62  ;;  %v2405_v28 = vld [vmem:[%s3251_s21] ss:$0 sm:$0xff]  ;;  %s3254_s21 = sld [smem:[#allocation12_spill]] }
 0x5cf   : > { %v1627_v35 = vadd.f32 %v1625_v30, %v3026_v1 }
 0x5d0   : > { %v1632_v36 = vsel %vm1011_vm5, %v1628_v32, -inf }
 0x5d1   : > { %1633 = vmax.xlane.f32.xlu0 %v1632_v36  ;;  %v1629_v48 = vsel %vm1011_vm5, %v1627_v35, -inf  ;;  %v2699_v36 = vld [vmem:[%s2924_s20] sm:$0xff]  }
 0x5d2   : > { %1630 = vmax.xlane.f32.xlu1 %v1629_v48  ;;  %v2700_v48 = vld [vmem:[%s2924_s20 + $0x8] sm:$0xff]  }
 0x65e   : > { %v1634_v37 = vpop.xlane.xlu0 %1633 }
 0x65f   : > { %v1636_v39 = vsub.f32 %v1628_v32, %v1634_v37  ;;  %v1631_v40 = vpop.xlane.xlu1 %1630  ;;  %v2701_v37 = vld [vmem:[%s2924_s20 + $0x10] sm:$0xff]  }
 0x660   : > { %v1635_v42 = vsub.f32 %v1627_v35, %v1631_v40  ;;  %v2406_v40 = vld [vmem:[%s3252_s24] ss:$0 sm:$0xff]  ;;  %s3255_s24 = sld [smem:[#allocation11_spill]] }
 0x661   : > { %v1639_v44 = vmul.f32 1.442695, %v1636_v39  ;;  %v2702_v39 = vld [vmem:[%s2924_s20 + $0x18] sm:$0xff]  }
 0x662   : > { %v1637_v45 = vmul.f32 1.442695, %v1635_v42 }
 0x663   : > { %2731 = vpow2.f32 %v1639_v44 }
 0x664   : > { %2733 = vpow2.f32 %v1637_v45 }
 0x66d   : > { %v2732_v46 = vpop.eup %2731 }
 0x66e   : > { %v2734_v47 = vpop.eup %2733  ;;  %v1644_v62 = vsel %vm1011_vm5, %v2732_v46, 0.0 }
 0x66f   : > { %1645 = vadd.xlane.f32.xlu1 %v1644_v62  ;;  %v1641_v1 = vsel %vm1011_vm5, %v2734_v47, 0.0 }
 0x670   : > { %1642 = vadd.xlane.f32.xlu0 %v1641_v1 }
 0x6fc   : > { %v1646_v50 = vpop.xlane.xlu1 %1645 }
 0x6fd   : > { %2735 = vrcp.f32 %v1646_v50  ;;  %v1643_v51 = vpop.xlane.xlu0 %1642 }
 0x6fe   : > { %2737 = vrcp.f32 %v1643_v51 }
 0x707   : > { %v2736_v52 = vpop.eup %2735 }
 0x708   : > { %v2738_v53 = vpop.eup %2737  ;;  %v1650_v55 = vmul.f32 %v2736_v52, %v2732_v46 }
 0x709   : > { %v1648_v54 = vmul.f32 %v2738_v53, %v2734_v47 }
 0x70b   : > { %2545 = vmatprep.mubr.msk.f32.mxu1 %vm1011_vm5, %v1648_v54 }
 0x70c   : > { %2546 = vmatmul.mubr.msk.f32.vlgmr.msra.gmra.mrb[2].mxu1 %vm1011_vm5, %v1650_v55 }
 0x70d   : > { %2572 = vmatprep.mubr.msk.bf16.mxu1 %vm2760_vm1, %v2759_v31  ;;  %2565 = vmatpush3.bf16.msra.mxu1 %v2699_v36  ;;  %v2417_v36 = vld [vmem:[%s786_s18] ss:$0 sm:$0xff] }
 0x70e   : > { %2566 = vmatprep.subr.bf16.mxu1 %v2759_v31 }
 0x711   : > { %2567 = vmatpush3.bf16.msra.mxu1 %v2700_v48 }
 0x712   : > { %2568 = vmatprep.subr.bf16.mxu1 %v2759_v31 }
 0x715   : > { %2569 = vmatpush3.bf16.msra.mxu1 %v2701_v37 }
 0x716   : > { %2570 = vmatprep.subr.bf16.mxu1 %v2759_v31 }
 0x719   : > { %2571 = vmatpush3.bf16.msra.mxu1 %v2702_v39 }
 0x7df   : > { %v2547_v57 = vpop.f32.mrb[2].mxu1 }
 0x7e0   : > { %v1728_v58 = vpop.f32.mrb[3].mxu1 }
 0x7e1   : > { %v1739_v59 = vpack.c.bf16 %v2547_v57, %v1728_v58 }
 0x7e3   : > { %2553 = vmatmul.mubr.msk.bf16.vlgmr.msra.gmra.mrb[8].mxu0 %vm868_vm2, %v1739_v59 }
 0x7e4   : > { %2560 = vmatprep.mubr.msk.bf16.mxu0 %vm2760_vm1, %v2759_v31 }
 0x8b6   : > { %v1800_v61 = vpop.f32.mrb[8].mxu0 }
 0x8b7   : > { %v1801_v63 = vadd.f32 %v2400_v60, %v1800_v61  ;;  %v2554_v0 = vpop.f32.mrb[9].mxu0 }
 0x8b8   : > { %v1803_v2 = vpop.f32.mrb[10].mxu0 }
 0x8b9   : > { %v1804_v3 = vadd.f32 %v2400_v60, %v1803_v2  ;;  %v2555_v4 = vpop.f32.mrb[11].mxu0  ;;  %v1807_v5 = vadd.f32 %v1801_v63, %v2961_v33 }
 0x8bb   : > { %v1811_v38 = vsel %vm868_vm2, %v1807_v5, 0.0  ;;  %v1808_v43 = vadd.f32 %v1804_v3, %v2963_v34  ;;  %v2697_v34 = vld [vmem:[%s2914_s28] sm:$0xff]  }
 0x8bc   : > { %1812 = vadd.xlane.f32.xlu0 %v1811_v38  ;;  %2557 = vmatpush3.bf16.msra.mxu0 %v2697_v34 }
 0x8bd   : > { %v1814_v6 = vsel %vm868_vm2, %v1808_v43, 0.0  ;;  %2558 = vmatprep.subr.bf16.mxu0 %v2759_v31 }
 0x8be   : > { %1815 = vadd.xlane.f32.xlu1 %v1814_v6 }
 0x8c0   : > { %2559 = vmatpush3.bf16.msra.mxu0 %v2698_v15 }
 0x8c1   : > { %2576 = vmatprep.subr.bf16.mxu0 %v2759_v31 }
 0x949   : > { %v1813_v41 = vpop.xlane.xlu0 %1812 }
 0x94a   : > { %v1818_v7 = vmul.f32 0.03125, %v1813_v41 }
 0x94b   : > { %v1816_v8 = vpop.xlane.xlu1 %1815 }
 0x94c   : > { %v1820_v9 = vsub.f32 %v1807_v5, %v1818_v7  ;;  %v1819_v10 = vmul.f32 0.03125, %v1816_v8  ;;  %v2410_v5 = vld [vmem:[%s780_s2] ss:$0 sm:$0xff]  ;;  %s3256_s2 = sld [smem:[#allocation13_spill]] }
 0x94e   : > { %v1821_v11 = vsub.f32 %v1808_v43, %v1819_v10  ;;  %v1822_v12 = vmul.f32 %v1820_v9, %v1820_v9 }
 0x950   : > { %v1824_v13 = vsel %vm868_vm2, %v1822_v12, 0.0  ;;  %v1823_v33 = vmul.f32 %v1821_v11, %v1821_v11 }
 0x951   : > { %1825 = vadd.xlane.f32.xlu0 %v1824_v13 }
 0x952   : > { %v1827_v14 = vsel %vm868_vm2, %v1823_v33, 0.0 }
 0x953   : > { %1828 = vadd.xlane.f32.xlu1 %v1827_v14 }
 0x9de   : > { %v1826_v16 = vpop.xlane.xlu0 %1825 }
 0x9df   : > { %v1830_v17 = vmul.f32 0.03125, %v1826_v16 }
 0x9e0   : > { %v1829_v18 = vpop.xlane.xlu1 %1828 }
 0x9e1   : > { %v1832_v19 = vadd.f32 1e-12, %v1830_v17  ;;  %v1831_v20 = vmul.f32 0.03125, %v1829_v18 }
 0x9e3   : > { %2739 = vrsqrt.f32 %v1832_v19  ;;  %v1833_v21 = vadd.f32 1e-12, %v1831_v20 }
 0x9e5   : > { %2741 = vrsqrt.f32 %v1833_v21  ;;  %v2703_v21 = vld [vmem:[%s3253_s29] sm:$0xff]  }
 0x9ed   : > { %v2740_v22 = vpop.eup %2739 }
 0x9ee   : > { %v1836_v24 = vmul.f32 %v2740_v22, %v1820_v9  ;;  %v2704_v22 = vld [vmem:[%s3253_s29 + $0x8] sm:$0xff]  }
 0x9ef   : > { %v2742_v25 = vpop.eup %2741 }
 0x9f0   : > { %v1844_v26 = vmul.f32 %v2404_v23, %v1836_v24  ;;  %v1837_v27 = vmul.f32 %v2742_v25, %v1821_v11 }
 0x9f2   : > { %v1845_v29 = vmul.f32 %v2404_v23, %v1837_v27  ;;  %v1852_v30 = vadd.f32 %v2405_v28, %v1844_v26 }
 0x9f4   : > { %v1853_v32 = vadd.f32 %v2405_v28, %v1845_v29 }
 0x9f6   : > { %v1854_v35 = vpack.c.bf16 %v1853_v32, %v1852_v30 }
 0x9f8   : > { %2561 = vmatmul.mubr.msk.bf16.vlgmr.msra.gmra.mrb[12].mxu0 %vm868_vm2, %v1854_v35 }
 0x9f9   : > { %2580 = vmatprep.mubr.msk.bf16.mxu0 %vm2760_vm1, %v2759_v31  ;;  %2577 = vmatpush3.bf16.msra.mxu0 %v2703_v21 }
 0x9fa   : > { %2578 = vmatprep.subr.bf16.mxu0 %v2759_v31 }
 0x9fd   : > { %2579 = vmatpush3.bf16.msra.mxu0 %v2704_v22 }
 0x9fe   : > { %2584 = vmatprep.subr.bf16.mxu0 %v2759_v31 }
 0xacb   : > { %v1915_v42 = vpop.f32.mrb[12].mxu0 }
 0xacc   : > { %v1916_v44 = vadd.f32 %v2406_v40, %v1915_v42  ;;  %v2562_v45 = vpop.f32.mrb[13].mxu0 }
 0xacd   : > { %v1918_v46 = vpop.f32.mrb[14].mxu0  ;;  %v2705_v45 = vld [vmem:[%s3254_s21] sm:$0xff]  }
 0xace   : > { %v1924_v47 = vmul.f32 0.044715, %v1916_v44  ;;  %v1919_v62 = vadd.f32 %v2406_v40, %v1918_v46  ;;  %v2563_v1 = vpop.f32.mrb[15].mxu0  ;;  %v1922_v61 = vmul.f32 0.5, %v1916_v44  ;;  %v2706_v46 = vld [vmem:[%s3254_s21 + $0x8] sm:$0xff]  }
 0xad0   : > { %v1926_v49 = vmul.f32 %v1924_v47, %v1916_v44  ;;  %v1925_v50 = vmul.f32 0.044715, %v1919_v62  ;;  %v1923_v63 = vmul.f32 0.5, %v1919_v62  ;;  %v2418_v47 = vld [vmem:[%s3255_s24] ss:$0 sm:$0xff] }
 0xad2   : > { %v1928_v51 = vmul.f32 %v1926_v49, %v1916_v44  ;;  %v1927_v52 = vmul.f32 %v1925_v50, %v1919_v62 }
 0xad4   : > { %v1930_v53 = vadd.f32 %v1928_v51, %v1916_v44  ;;  %v1929_v54 = vmul.f32 %v1927_v52, %v1919_v62 }
 0xad6   : > { %v1932_v55 = vmul.f32 0.7978846, %v1930_v53  ;;  %v1931_v56 = vadd.f32 %v1929_v54, %v1919_v62 }
 0xad8   : > { %2743 = vtanh.f32 %v1932_v55  ;;  %v1933_v57 = vmul.f32 0.7978846, %v1931_v56 }
 0xada   : > { %2745 = vtanh.f32 %v1933_v57 }
 0xae2   : > { %v2744_v58 = vpop.eup %2743 }
 0xae3   : > { %v1936_v59 = vadd.f32 1.0, %v2744_v58 }
 0xae4   : > { %v2746_v60 = vpop.eup %2745 }
 0xae5   : > { %v1937_v0 = vadd.f32 1.0, %v2746_v60  ;;  %v1938_v2 = vmul.f32 %v1936_v59, %v1922_v61 }
 0xae7   : > { %v1939_v3 = vmul.f32 %v1937_v0, %v1923_v63 }
 0xae9   : > { %v1940_v4 = vpack.c.bf16 %v1939_v3, %v1938_v2 }
 0xaeb   : > { %2573 = vmatmul.mubr.msk.bf16.vlgmr.msra.gmra.mrb[8].mxu1 %vm1980_vm3, %v1940_v4 }
 0xbbe   : > { %v2018_v38 = vpop.f32.mrb[8].mxu1 }
 0xbbf   : > { %v2019_v43 = vadd.f32 %v2410_v5, %v2018_v38  ;;  %v2574_v6 = vpop.f32.mrb[9].mxu1 }
 0xbc0   : > { %v2021_v41 = vpop.f32.mrb[10].mxu1 }
 0xbc1   : > { %v2022_v7 = vadd.f32 %v2410_v5, %v2021_v41  ;;  %v2575_v8 = vpop.f32.mrb[11].mxu1  ;;  %v2025_v9 = vadd.f32 %v2019_v43, %v1852_v30  ;;  %v2416_v30 = vld [vmem:[%s783_s26] ss:$0 sm:$0xff] }
 0xbc3   : > { %v2029_v10 = vsel %vm868_vm2, %v2025_v9, 0.0  ;;  %v2026_v11 = vadd.f32 %v2022_v7, %v1853_v32 }
 0xbc4   : > { %2030 = vadd.xlane.f32.xlu0 %v2029_v10 }
 0xbc5   : > { %v2032_v12 = vsel %vm868_vm2, %v2026_v11, 0.0 }
 0xbc6   : > { %2033 = vadd.xlane.f32.xlu1 %v2032_v12 }
 0xc51   : > { %v2031_v13 = vpop.xlane.xlu0 %2030 }
 0xc52   : > { %v2035_v33 = vmul.f32 0.03125, %v2031_v13 }
 0xc53   : > { %v2034_v14 = vpop.xlane.xlu1 %2033 }
 0xc54   : > { %v2037_v34 = vsub.f32 %v2025_v9, %v2035_v33  ;;  %v2036_v15 = vmul.f32 0.03125, %v2034_v14 }
 0xc56   : > { %v2038_v16 = vsub.f32 %v2026_v11, %v2036_v15  ;;  %v2039_v17 = vmul.f32 %v2037_v34, %v2037_v34 }
 0xc58   : > { %v2041_v18 = vsel %vm868_vm2, %v2039_v17, 0.0  ;;  %v2040_v19 = vmul.f32 %v2038_v16, %v2038_v16 }
 0xc59   : > { %2042 = vadd.xlane.f32.xlu0 %v2041_v18 }
 0xc5a   : > { %v2044_v20 = vsel %vm868_vm2, %v2040_v19, 0.0 }
 0xc5b   : > { %2045 = vadd.xlane.f32.xlu1 %v2044_v20 }
 0xce6   : > { %v2043_v23 = vpop.xlane.xlu0 %2042 }
 0xce7   : > { %v2047_v24 = vmul.f32 0.03125, %v2043_v23 }
 0xce8   : > { %v2046_v25 = vpop.xlane.xlu1 %2045 }
 0xce9   : > { %v2049_v26 = vadd.f32 1e-12, %v2047_v24  ;;  %v2048_v27 = vmul.f32 0.03125, %v2046_v25 }
 0xceb   : > { %2747 = vrsqrt.f32 %v2049_v26  ;;  %v2050_v28 = vadd.f32 1e-12, %v2048_v27 }
 0xced   : > { %2749 = vrsqrt.f32 %v2050_v28 }
 0xcf5   : > { %v2748_v29 = vpop.eup %2747 }
 0xcf6   : > { %v2053_v32 = vmul.f32 %v2748_v29, %v2037_v34 }
 0xcf7   : > { %v2750_v35 = vpop.eup %2749 }
 0xcf8   : > { %v2061_v48 = vmul.f32 %v2416_v30, %v2053_v32  ;;  %v2054_v37 = vmul.f32 %v2750_v35, %v2038_v16 }
 0xcfa   : > { %v2062_v39 = vmul.f32 %v2416_v30, %v2054_v37  ;;  %v2069_v40 = vadd.f32 %v2417_v36, %v2061_v48 }
 0xcfc   : > { %v2070_v42 = vadd.f32 %v2417_v36, %v2062_v39  ;;  %2071 = vst.msk [vmem:[#allocation2] sm:$0xff] %vm868_vm2, %v2069_v40 }
 0xcfe   : > { %2072 = vst.msk [vmem:[#allocation2 + $0x8] sm:$0xff] %vm868_vm2, %v2070_v42  ;;  %v2073_v44 = vpack.c.bf16 %v2070_v42, %v2069_v40 }
 0xd00   : > { %2581 = vmatmul.mubr.msk.bf16.vlgmr.msra.gmra.mrb[16].mxu0 %vm868_vm2, %v2073_v44 }
 0xd01   : > { %2588 = vmatprep.mubr.msk.bf16.mxu0 %vm2760_vm1, %v2759_v31  ;;  %2585 = vmatpush3.bf16.msra.mxu0 %v2705_v45 }
 0xd02   : > { %2586 = vmatprep.subr.bf16.mxu0 %v2759_v31  ;;  %v2422_v31 = vld [vmem:[%s3256_s2] ss:$0 sm:$0xff] }
 0xd05   : > { %2587 = vmatpush3.bf16.msra.mxu0 %v2706_v46 }
 0xdd3   : > { %v2134_v62 = vpop.f32.mrb[16].mxu0 }
 0xdd4   : > { %v2135_v1 = vadd.f32 %v2418_v47, %v2134_v62  ;;  %v2582_v49 = vpop.f32.mrb[17].mxu0 }
 0xdd5   : > { %v2137_v50 = vpop.f32.mrb[18].mxu0 }
 0xdd6   : > { %v2138_v51 = vadd.f32 %v2418_v47, %v2137_v50  ;;  %v2583_v52 = vpop.f32.mrb[19].mxu0  ;;  %v2141_v53 = vmax.f32 %v2135_v1, 0.0 }
 0xdd8   : > { %v2142_v54 = vmax.f32 %v2138_v51, 0.0 }
 0xdda   : > { %v2143_v55 = vpack.c.bf16 %v2142_v54, %v2141_v53 }
 0xddc   : > { %2589 = vmatmul.mubr.msk.bf16.vlgmr.msra.gmra.mrb[20].mxu0 %vm868_vm2, %v2143_v55 }
 0xeaf   : > { %v2204_v56 = vpop.f32.mrb[20].mxu0 }
 0xeb0   : > { %v2205_v57 = vadd.f32 %v2422_v31, %v2204_v56  ;;  %v2590_v58 = vpop.f32.mrb[21].mxu0 }
 0xeb1   : > { %v2207_v59 = vpop.f32.mrb[22].mxu0 }
 0xeb2   : > { %2211 = vst [vmem:[%s3257_s16] sm:$0xff] %v2205_v57  ;;  %v2208_v60 = vadd.f32 %v2422_v31, %v2207_v59  ;;  %v2591_v61 = vpop.f32.mrb[23].mxu0 }
 0xeb4   : > { %2212 = vst [vmem:[%s3257_s16 + $0x8] sm:$0xff] %v2208_v60 }
 0xeb5 PF: > { %s3258_s22 = sld [smem:[#allocation3_spill]] }
 0xebb   : > { %s30_s1 = sadd.s32 1, %s3258_s22  }
 0xebc   : > { %p27_p5 = scmp.ge.s32.totalorder %s30_s1, 4  }
 0xebe   :  { %29 = sbr.rel (!%p27_p5) target bundleno = 12 (0xc), region = 163 }

</bundles_post_ra>
